<compile_context>
chip_gen: v7x
topology: tpu7x:2x2x1
jax: 0.10.0
libtpu: 0.0.40
codegen_flags: <defaults>
</compile_context>

<pallas_src>
import functools

import jax
import jax.numpy as jnp
from jax.experimental import pallas as pl
from jax.experimental.pallas import tpu as pltpu


def _gru_kernel(x_ref, wih_hbm, whh_hbm, bx_hbm, bhn_hbm, wfc_hbm, bfc_hbm,
                out_ref,
                wih_v, whh_v, bx_v, bhn_v, wfc_v, bfc_v, h_ref,
                *, tT, Hp, T, I, mask_tail, mxu_inproj, n_chains, mxu_dtype):
    """One (batch block, time chunk) grid step of the GRU.

    x_ref    : (tT, bB, Ix)  time-major input chunk (Ix = I if VPU path)
    *_hbm    : raw HBM refs for the constant operands (single-buffered)
    *_v      : VMEM scratch copies of the constants (loaded at t_chunk == 0)
    out_ref  : (bB, Op)      written only on the last time chunk
    h_ref    : (bB, Hp)      VMEM scratch carrying h across time chunks
    """
    t_chunk = pl.program_id(1)
    nt = pl.num_programs(1)
    bB = h_ref.shape[0]
    cB = bB // n_chains

    @pl.when(t_chunk == 0)
    def _init():
        # One-time (per batch block) weight load: constants are single
        # buffered in VMEM instead of being double-buffered every grid step.
        pltpu.sync_copy(wih_hbm, wih_v)
        pltpu.sync_copy(whh_hbm, whh_v)
        pltpu.sync_copy(bx_hbm, bx_v)
        pltpu.sync_copy(bhn_hbm, bhn_v)
        pltpu.sync_copy(wfc_hbm, wfc_v)
        pltpu.sync_copy(bfc_hbm, bfc_v)
        h_ref[...] = jnp.zeros_like(h_ref)

    whh = whh_v[...]
    bx = bx_v[...]          # (1, 3Hp) = [b_ir+b_hr, b_iz+b_hz, b_in]
    b_hn = bhn_v[...]       # (1, Hp)  (must stay inside r*(...))

    # ---- Input projection ----
    if mxu_inproj:
        # Hoisted: one (tT*bB, Ix) x (Ix, 3Hp) MXU matmul per chunk.
        Ix = x_ref.shape[-1]
        x2d = x_ref[...].reshape(tT * bB, Ix)
        gx = (jnp.dot(x2d.astype(mxu_dtype), wih_v[...],
                      preferred_element_type=jnp.float32) + bx)

        def gx_t(j):
            return gx[j * bB:(j + 1) * bB, :]
    else:
        # Tiny I: VPU outer product, no 128x feature padding of x in HBM.
        wih = wih_v[...]                      # (I, 3Hp), f32

        def gx_t(j):
            xj = x_ref[j]                     # (bB, I)
            acc = bx                          # (1, 3Hp) -> broadcasts
            for i in range(I):
                acc = acc + xj[:, i:i + 1] * wih[i:i + 1, :]
            return acc                        # (bB, 3Hp)

    # ---- Recurrence: statically unrolled, n_chains independent chains ----
    chains = [h_ref[c * cB:(c + 1) * cB, :] for c in range(n_chains)]
    for j in range(tT):
        g = gx_t(j)                           # (bB, 3Hp)
        new_chains = []
        for c in range(n_chains):
            hc = chains[c]
            gc = g[c * cB:(c + 1) * cB, :] if n_chains > 1 else g
            gh = jnp.dot(hc.astype(mxu_dtype), whh,
                         preferred_element_type=jnp.float32)  # (cB, 3Hp)
            r = jax.nn.sigmoid(gc[:, :Hp] + gh[:, :Hp])
            z = jax.nn.sigmoid(gc[:, Hp:2 * Hp] + gh[:, Hp:2 * Hp])
            n = jnp.tanh(gc[:, 2 * Hp:] + r * (gh[:, 2 * Hp:] + b_hn))
            hc_new = (1.0 - z) * n + z * hc
            if mask_tail:
                valid = (t_chunk * tT + j) < T
                hc_new = jnp.where(valid, hc_new, hc)
            new_chains.append(hc_new)
        chains = new_chains

    for c in range(n_chains):
        h_ref[c * cB:(c + 1) * cB, :] = chains[c]

    # ---- Final Linear on the last timestep's hidden state ----
    @pl.when(t_chunk == nt - 1)
    def _final():
        for c in range(n_chains):
            out_ref[c * cB:(c + 1) * cB, :] = (
                jnp.dot(chains[c].astype(mxu_dtype), wfc_v[...],
                        preferred_element_type=jnp.float32)
                + bfc_v[...]).astype(out_ref.dtype)


def simple_gru_forward(x, params, *, time_chunk=16, mxu_dtype=jnp.float32):
    """x: (B, T, input_size) batch_first, float32. Returns (B, output_size)."""
    w_ih, w_hh, b_ih, b_hh, w_fc, b_fc = params
    B, T, I = x.shape
    H = w_hh.shape[1]
    O = w_fc.shape[0]
    f32 = jnp.float32

    def rup(v, m):
        return (v + m - 1) // m * m

    Hp = rup(H, 128)                  # lane-aligned per-gate hidden dim
    Op = rup(O, 128)                  # lane-dense output stores

    # Batch tiling: cap at 256 (fills v6e/v7x MXU M dim); ensure >= 2 batch
    # blocks when possible so v7x's 2nd TensorCore is not idle.
    bB = min(rup(B, 8), 256)
    if rup(B, bB) // bB < 2 and bB > 8:
        bB = max(8, rup(bB // 2, 8))
    Bp = rup(B, bB)
    nb = Bp // bB

    # Two interleaved hidden-state chains when the block splits into
    # sublane-aligned halves (hides matmul->EUP latency of the recurrence).
    n_chains = 2 if (bB % 16 == 0) else 1

    # Time chunking: prefer tT dividing T so the tail mask disappears.
    tT = min(time_chunk, T)
    while tT > 1 and T % tT:
        tT -= 1
    if tT < max(1, min(time_chunk, T) // 2):
        tT = min(time_chunk, T)       # no good divisor: chunk + tail mask
    Tp = rup(T, tT)
    nt = Tp // tT
    mask_tail = (Tp != T)

    # Input-feature handling: no 128x HBM pad for tiny I (VPU path).
    mxu_inproj = I > 16
    Ix = rup(I, 128) if mxu_inproj else I

    # Time-major, zero-padded input.
    x_tm = jnp.transpose(x.astype(f32), (1, 0, 2))
    x_tm = jnp.pad(x_tm, ((0, Tp - T), (0, Bp - B), (0, Ix - I)))

    # Per-gate (r, z, n), lane-aligned, pre-transposed weights.
    wih_dt = mxu_dtype if mxu_inproj else f32

    def pad_gate_w(g, rows_p, dt):    # g: (H, rows) -> (rows_p, Hp)
        return jnp.pad(g.T.astype(dt), ((0, rows_p - g.shape[1]), (0, Hp - H)))

    w_ih_g = jnp.split(w_ih, 3, axis=0)          # each (H, I)
    w_hh_g = jnp.split(w_hh, 3, axis=0)          # each (H, H)
    wih = jnp.concatenate([pad_gate_w(g, Ix, wih_dt) for g in w_ih_g], axis=1)
    whh = jnp.concatenate([pad_gate_w(g, Hp, mxu_dtype) for g in w_hh_g], axis=1)

    b_ih_g = jnp.split(b_ih.astype(f32), 3)
    b_hh_g = jnp.split(b_hh.astype(f32), 3)

    def padb(v):
        return jnp.pad(v, (0, Hp - H))

    # r/z biases fold; b_in folds into gx; b_hn must stay inside r*(...).
    b_x = jnp.concatenate([padb(b_ih_g[0] + b_hh_g[0]),
                           padb(b_ih_g[1] + b_hh_g[1]),
                           padb(b_ih_g[2])]).reshape(1, 3 * Hp)
    b_hn = padb(b_hh_g[2]).reshape(1, Hp)

    wfc = jnp.pad(w_fc.T.astype(mxu_dtype), ((0, Hp - H), (0, Op - O)))
    bfc = jnp.pad(b_fc.astype(f32), (0, Op - O)).reshape(1, Op)

    # Explicit VMEM budget (single-buffered weights + double-buffered x tile
    # + output + live intermediates), with headroom.
    bpe = jnp.dtype(mxu_dtype).itemsize
    wbytes = ((Ix * 3 * Hp) * (bpe if mxu_inproj else 4)
              + Hp * 3 * Hp * bpe + Hp * Op * bpe + (4 * Hp + Op) * 4)
    xbytes = 2 * tT * bB * Ix * 4
    gxbytes = (tT * bB * 3 * Hp * 4) if mxu_inproj else (bB * 3 * Hp * 4)
    live = 8 * bB * Hp * 4
    est = wbytes + xbytes + gxbytes + live + bB * Hp * 4 + 2 * bB * Op * 4
    vmem_limit = int(min(64 * 2**20, max(32 * 2**20, int(1.5 * est) + (4 << 20))))

    kernel = functools.partial(_gru_kernel, tT=tT, Hp=Hp, T=T, I=I,
                               mask_tail=mask_tail, mxu_inproj=mxu_inproj,
                               n_chains=n_chains, mxu_dtype=mxu_dtype)

    x_spec = pl.BlockSpec((tT, bB, Ix), lambda b, t: (t, b, 0))
    hbm = pl.BlockSpec(memory_space=pl.ANY)   # constants: no auto double-buffer

    out_p = pl.pallas_call(
        kernel,
        out_shape=jax.ShapeDtypeStruct((Bp, Op), f32),
        grid_spec=pltpu.PrefetchScalarGridSpec(
            num_scalar_prefetch=0,
            grid=(nb, nt),
            in_specs=[x_spec, hbm, hbm, hbm, hbm, hbm, hbm],
            out_specs=pl.BlockSpec((bB, Op), lambda b, t: (b, 0)),
            scratch_shapes=[
                pltpu.VMEM((Ix, 3 * Hp), wih.dtype),
                pltpu.VMEM((Hp, 3 * Hp), whh.dtype),
                pltpu.VMEM((1, 3 * Hp), f32),
                pltpu.VMEM((1, Hp), f32),
                pltpu.VMEM((Hp, Op), wfc.dtype),
                pltpu.VMEM((1, Op), f32),
                pltpu.VMEM((bB, Hp), f32),
            ],
        ),
        compiler_params=pltpu.CompilerParams(
            dimension_semantics=("parallel", "arbitrary"),
            vmem_limit_bytes=vmem_limit),
    )(x_tm, wih, whh, b_x, b_hn, wfc, bfc)

    return out_p[:B, :O]


def _reference_forward(x, params):
    """Pure-JAX reference with identical PyTorch GRU semantics."""
    w_ih, w_hh, b_ih, b_hh, w_fc, b_fc = params
    B, T, I = x.shape
    H = w_hh.shape[1]

    def step(h, x_t):
        gx = x_t @ w_ih.T + b_ih
        gh = h @ w_hh.T + b_hh
        r = jax.nn.sigmoid(gx[:, 0:H] + gh[:, 0:H])
        z = jax.nn.sigmoid(gx[:, H:2 * H] + gh[:, H:2 * H])
        n = jnp.tanh(gx[:, 2 * H:3 * H] + r * gh[:, 2 * H:3 * H])
        h_new = (1.0 - z) * n + z * h
        return h_new, None

    h0 = jnp.zeros((B, H), jnp.float32)
    h_last, _ = jax.lax.scan(step, h0, jnp.transpose(x, (1, 0, 2)))
    return h_last @ w_fc.T + b_fc


if __name__ == "__main__":
    # Module hyperparameters (defaults of SimpleGRU)
    INPUT_SIZE = 1
    HIDDEN_SIZE = 10
    OUTPUT_SIZE = 1
    B, T = 2, 8

    key = jax.random.PRNGKey(0)
    ks = jax.random.split(key, 7)

    scale = 1.0 / jnp.sqrt(HIDDEN_SIZE)
    w_ih = jax.random.uniform(ks[0], (3 * HIDDEN_SIZE, INPUT_SIZE),
                              minval=-scale, maxval=scale, dtype=jnp.float32)
    w_hh = jax.random.uniform(ks[1], (3 * HIDDEN_SIZE, HIDDEN_SIZE),
                              minval=-scale, maxval=scale, dtype=jnp.float32)
    b_ih = jax.random.uniform(ks[2], (3 * HIDDEN_SIZE,),
                              minval=-scale, maxval=scale, dtype=jnp.float32)
    b_hh = jax.random.uniform(ks[3], (3 * HIDDEN_SIZE,),
                              minval=-scale, maxval=scale, dtype=jnp.float32)
    w_fc = jax.random.uniform(ks[4], (OUTPUT_SIZE, HIDDEN_SIZE),
                              minval=-scale, maxval=scale, dtype=jnp.float32)
    b_fc = jax.random.uniform(ks[5], (OUTPUT_SIZE,),
                              minval=-scale, maxval=scale, dtype=jnp.float32)
    params = (w_ih, w_hh, b_ih, b_hh, w_fc, b_fc)

    x = jax.random.normal(ks[6], (B, T, INPUT_SIZE), dtype=jnp.float32)

    out = jax.block_until_ready(simple_gru_forward(x, params))
    ref = jax.block_until_ready(_reference_forward(x, params))

    assert out.shape == (B, OUTPUT_SIZE), out.shape
    assert jnp.allclose(out, ref, atol=1e-5, rtol=1e-5), (out, ref)

    print("KERNEL_OK")
</pallas_src>

<mosaic_0001>
module attributes {stable_mosaic.version = 11 : i64} {
  func.func @_gru_kernel(%arg0: i32, %arg1: i32, %arg2: memref<8x8x1xf32, #tpu.memory_space<vmem>>, %arg3: memref<1x384xf32, #tpu.memory_space<any>>, %arg4: memref<128x384xf32, #tpu.memory_space<any>>, %arg5: memref<1x384xf32, #tpu.memory_space<any>>, %arg6: memref<1x128xf32, #tpu.memory_space<any>>, %arg7: memref<128x128xf32, #tpu.memory_space<any>>, %arg8: memref<1x128xf32, #tpu.memory_space<any>>, %arg9: memref<8x128xf32, #tpu.memory_space<vmem>>, %arg10: memref<1x384xf32, #tpu.memory_space<vmem>>, %arg11: memref<128x384xf32, #tpu.memory_space<vmem>>, %arg12: memref<1x384xf32, #tpu.memory_space<vmem>>, %arg13: memref<1x128xf32, #tpu.memory_space<vmem>>, %arg14: memref<128x128xf32, #tpu.memory_space<vmem>>, %arg15: memref<1x128xf32, #tpu.memory_space<vmem>>, %arg16: memref<8x128xf32, #tpu.memory_space<vmem>>) attributes {dimension_semantics = [#tpu.dimension_semantics<parallel>, #tpu.dimension_semantics<arbitrary>], iteration_bounds = array<i64: 1, 1>, scalar_prefetch = 0 : i64, scratch_operands = 7 : i64, tpu.core_type = #tpu.core_type<tc>, window_params = [{transform_indices = @transform_0, window_bounds = array<i64: 8, 8, 1>}, {}, {}, {}, {}, {}, {}, {transform_indices = @transform_7, window_bounds = array<i64: 8, 128>}]} {
    %c0_i32 = arith.constant 0 : i32
    %0 = arith.cmpi eq, %arg1, %c0_i32 : i32
    %1 = arith.extui %0 : i1 to i32
    %c0_i32_0 = arith.constant 0 : i32
    %2 = arith.cmpi ne, %1, %c0_i32_0 : i32
    scf.if %2 {
      "tpu.region"() ({
        %302 = tpu.sem_alloc : memref<!tpu.dma_semaphore, #tpu.memory_space<semaphore_mem>>
        tpu.enqueue_dma source(%arg3 : memref<1x384xf32, #tpu.memory_space<any>>) target(%arg10 : memref<1x384xf32, #tpu.memory_space<vmem>>) target_semaphore(%302 : memref<!tpu.dma_semaphore, #tpu.memory_space<semaphore_mem>>)
        tpu.wait_dma2 semaphore(%302 : memref<!tpu.dma_semaphore, #tpu.memory_space<semaphore_mem>>) src(%arg3 : memref<1x384xf32, #tpu.memory_space<any>>) dst(%arg10 : memref<1x384xf32, #tpu.memory_space<vmem>>)
        tpu.yield
      }) : () -> ()
      "tpu.region"() ({
        %302 = tpu.sem_alloc : memref<!tpu.dma_semaphore, #tpu.memory_space<semaphore_mem>>
        tpu.enqueue_dma source(%arg4 : memref<128x384xf32, #tpu.memory_space<any>>) target(%arg11 : memref<128x384xf32, #tpu.memory_space<vmem>>) target_semaphore(%302 : memref<!tpu.dma_semaphore, #tpu.memory_space<semaphore_mem>>)
        tpu.wait_dma2 semaphore(%302 : memref<!tpu.dma_semaphore, #tpu.memory_space<semaphore_mem>>) src(%arg4 : memref<128x384xf32, #tpu.memory_space<any>>) dst(%arg11 : memref<128x384xf32, #tpu.memory_space<vmem>>)
        tpu.yield
      }) : () -> ()
      "tpu.region"() ({
        %302 = tpu.sem_alloc : memref<!tpu.dma_semaphore, #tpu.memory_space<semaphore_mem>>
        tpu.enqueue_dma source(%arg5 : memref<1x384xf32, #tpu.memory_space<any>>) target(%arg12 : memref<1x384xf32, #tpu.memory_space<vmem>>) target_semaphore(%302 : memref<!tpu.dma_semaphore, #tpu.memory_space<semaphore_mem>>)
        tpu.wait_dma2 semaphore(%302 : memref<!tpu.dma_semaphore, #tpu.memory_space<semaphore_mem>>) src(%arg5 : memref<1x384xf32, #tpu.memory_space<any>>) dst(%arg12 : memref<1x384xf32, #tpu.memory_space<vmem>>)
        tpu.yield
      }) : () -> ()
      "tpu.region"() ({
        %302 = tpu.sem_alloc : memref<!tpu.dma_semaphore, #tpu.memory_space<semaphore_mem>>
        tpu.enqueue_dma source(%arg6 : memref<1x128xf32, #tpu.memory_space<any>>) target(%arg13 : memref<1x128xf32, #tpu.memory_space<vmem>>) target_semaphore(%302 : memref<!tpu.dma_semaphore, #tpu.memory_space<semaphore_mem>>)
        tpu.wait_dma2 semaphore(%302 : memref<!tpu.dma_semaphore, #tpu.memory_space<semaphore_mem>>) src(%arg6 : memref<1x128xf32, #tpu.memory_space<any>>) dst(%arg13 : memref<1x128xf32, #tpu.memory_space<vmem>>)
        tpu.yield
      }) : () -> ()
      "tpu.region"() ({
        %302 = tpu.sem_alloc : memref<!tpu.dma_semaphore, #tpu.memory_space<semaphore_mem>>
        tpu.enqueue_dma source(%arg7 : memref<128x128xf32, #tpu.memory_space<any>>) target(%arg14 : memref<128x128xf32, #tpu.memory_space<vmem>>) target_semaphore(%302 : memref<!tpu.dma_semaphore, #tpu.memory_space<semaphore_mem>>)
        tpu.wait_dma2 semaphore(%302 : memref<!tpu.dma_semaphore, #tpu.memory_space<semaphore_mem>>) src(%arg7 : memref<128x128xf32, #tpu.memory_space<any>>) dst(%arg14 : memref<128x128xf32, #tpu.memory_space<vmem>>)
        tpu.yield
      }) : () -> ()
      "tpu.region"() ({
        %302 = tpu.sem_alloc : memref<!tpu.dma_semaphore, #tpu.memory_space<semaphore_mem>>
        tpu.enqueue_dma source(%arg8 : memref<1x128xf32, #tpu.memory_space<any>>) target(%arg15 : memref<1x128xf32, #tpu.memory_space<vmem>>) target_semaphore(%302 : memref<!tpu.dma_semaphore, #tpu.memory_space<semaphore_mem>>)
        tpu.wait_dma2 semaphore(%302 : memref<!tpu.dma_semaphore, #tpu.memory_space<semaphore_mem>>) src(%arg8 : memref<1x128xf32, #tpu.memory_space<any>>) dst(%arg15 : memref<1x128xf32, #tpu.memory_space<vmem>>)
        tpu.yield
      }) : () -> ()
      %cst_62 = arith.constant 0.000000e+00 : f32
      %300 = vector.broadcast %cst_62 : f32 to vector<8x128xf32>
      %c0_63 = arith.constant 0 : index
      %c0_64 = arith.constant 0 : index
      %301 = vector.load %arg16[%c0_63, %c0_64] : memref<8x128xf32, #tpu.memory_space<vmem>>, vector<8x128xf32>
      tpu.vector_store %arg16[%c0_63, %c0_64], %300 {strides = array<i32>} : memref<8x128xf32, #tpu.memory_space<vmem>>, vector<8x128xf32>,
    } else {
    }
    %c0 = arith.constant 0 : index
    %c0_1 = arith.constant 0 : index
    %3 = vector.load %arg11[%c0, %c0_1] : memref<128x384xf32, #tpu.memory_space<vmem>>, vector<128x384xf32>
    %c0_2 = arith.constant 0 : index
    %c0_3 = arith.constant 0 : index
    %4 = vector.load %arg12[%c0_2, %c0_3] : memref<1x384xf32, #tpu.memory_space<vmem>>, vector<1x384xf32>
    %c0_4 = arith.constant 0 : index
    %c0_5 = arith.constant 0 : index
    %5 = vector.load %arg13[%c0_4, %c0_5] : memref<1x128xf32, #tpu.memory_space<vmem>>, vector<1x128xf32>
    %c0_6 = arith.constant 0 : index
    %c0_7 = arith.constant 0 : index
    %6 = vector.load %arg10[%c0_6, %c0_7] : memref<1x384xf32, #tpu.memory_space<vmem>>, vector<1x384xf32>
    %c0_8 = arith.constant 0 : index
    %c0_9 = arith.constant 0 : index
    %7 = vector.load %arg16[%c0_8, %c0_9] : memref<8x128xf32, #tpu.memory_space<vmem>>, vector<8x128xf32>
    %c0_10 = arith.constant 0 : index
    %c0_11 = arith.constant 0 : index
    %c0_12 = arith.constant 0 : index
    %8 = vector.load %arg2[%c0_10, %c0_11, %c0_12] : memref<8x8x1xf32, #tpu.memory_space<vmem>>, vector<1x8x1xf32>
    %9 = vector.shape_cast %8 : vector<1x8x1xf32> to vector<8x1xf32>
    %10 = vector.broadcast %9 : vector<8x1xf32> to vector<8x384xf32>
    %11 = vector.broadcast %6 : vector<1x384xf32> to vector<8x384xf32>
    %12 = arith.mulf %10, %11 : vector<8x384xf32>
    %13 = vector.broadcast %4 : vector<1x384xf32> to vector<8x384xf32>
    %14 = arith.addf %13, %12 : vector<8x384xf32>
    %cst = arith.constant dense<0.000000e+00> : vector<8x384xf32>
    %15 = tpu.matmul %7, %3, %cst {dimension_numbers = #tpu.dot_dimension_numbers<[1], [0], [0], [1], [0, 0, 1, 1], [], []>} : vector<8x128xf32>, vector<128x384xf32>, vector<8x384xf32> -> vector<8x384xf32>
    %16 = vector.extract_strided_slice %14 {offsets = [0, 0], sizes = [8, 128], strides = [1, 1]} : vector<8x384xf32> to vector<8x128xf32>
    %17 = vector.extract_strided_slice %15 {offsets = [0, 0], sizes = [8, 128], strides = [1, 1]} : vector<8x384xf32> to vector<8x128xf32>
    %18 = arith.addf %16, %17 : vector<8x128xf32>
    %19 = arith.negf %18 : vector<8x128xf32>
    %20 = math.exp %19 : vector<8x128xf32>
    %cst_13 = arith.constant 1.000000e+00 : f32
    %21 = vector.broadcast %cst_13 : f32 to vector<8x128xf32>
    %22 = arith.addf %21, %20 : vector<8x128xf32>
    %23 = arith.divf %21, %22 : vector<8x128xf32>
    %24 = vector.extract_strided_slice %14 {offsets = [0, 128], sizes = [8, 128], strides = [1, 1]} : vector<8x384xf32> to vector<8x128xf32>
    %25 = vector.extract_strided_slice %15 {offsets = [0, 128], sizes = [8, 128], strides = [1, 1]} : vector<8x384xf32> to vector<8x128xf32>
    %26 = arith.addf %24, %25 : vector<8x128xf32>
    %27 = arith.negf %26 : vector<8x128xf32>
    %28 = math.exp %27 : vector<8x128xf32>
    %cst_14 = arith.constant 1.000000e+00 : f32
    %29 = vector.broadcast %cst_14 : f32 to vector<8x128xf32>
    %30 = arith.addf %29, %28 : vector<8x128xf32>
    %31 = arith.divf %29, %30 : vector<8x128xf32>
    %32 = vector.extract_strided_slice %14 {offsets = [0, 256], sizes = [8, 128], strides = [1, 1]} : vector<8x384xf32> to vector<8x128xf32>
    %33 = vector.extract_strided_slice %15 {offsets = [0, 256], sizes = [8, 128], strides = [1, 1]} : vector<8x384xf32> to vector<8x128xf32>
    %34 = vector.broadcast %5 : vector<1x128xf32> to vector<8x128xf32>
    %35 = arith.addf %33, %34 : vector<8x128xf32>
    %36 = arith.mulf %23, %35 : vector<8x128xf32>
    %37 = arith.addf %32, %36 : vector<8x128xf32>
    %38 = math.tanh %37 : vector<8x128xf32>
    %cst_15 = arith.constant 1.000000e+00 : f32
    %39 = vector.broadcast %cst_15 : f32 to vector<8x128xf32>
    %40 = arith.subf %39, %31 : vector<8x128xf32>
    %41 = arith.mulf %40, %38 : vector<8x128xf32>
    %42 = arith.mulf %31, %7 : vector<8x128xf32>
    %43 = arith.addf %41, %42 : vector<8x128xf32>
    %c1 = arith.constant 1 : index
    %c0_16 = arith.constant 0 : index
    %c0_17 = arith.constant 0 : index
    %44 = vector.load %arg2[%c1, %c0_16, %c0_17] : memref<8x8x1xf32, #tpu.memory_space<vmem>>, vector<1x8x1xf32>
    %45 = vector.shape_cast %44 : vector<1x8x1xf32> to vector<8x1xf32>
    %46 = vector.broadcast %45 : vector<8x1xf32> to vector<8x384xf32>
    %47 = vector.broadcast %6 : vector<1x384xf32> to vector<8x384xf32>
    %48 = arith.mulf %46, %47 : vector<8x384xf32>
    %49 = vector.broadcast %4 : vector<1x384xf32> to vector<8x384xf32>
    %50 = arith.addf %49, %48 : vector<8x384xf32>
    %cst_18 = arith.constant dense<0.000000e+00> : vector<8x384xf32>
    %51 = tpu.matmul %43, %3, %cst_18 {dimension_numbers = #tpu.dot_dimension_numbers<[1], [0], [0], [1], [0, 0, 1, 1], [], []>} : vector<8x128xf32>, vector<128x384xf32>, vector<8x384xf32> -> vector<8x384xf32>
    %52 = vector.extract_strided_slice %50 {offsets = [0, 0], sizes = [8, 128], strides = [1, 1]} : vector<8x384xf32> to vector<8x128xf32>
    %53 = vector.extract_strided_slice %51 {offsets = [0, 0], sizes = [8, 128], strides = [1, 1]} : vector<8x384xf32> to vector<8x128xf32>
    %54 = arith.addf %52, %53 : vector<8x128xf32>
    %55 = arith.negf %54 : vector<8x128xf32>
    %56 = math.exp %55 : vector<8x128xf32>
    %cst_19 = arith.constant 1.000000e+00 : f32
    %57 = vector.broadcast %cst_19 : f32 to vector<8x128xf32>
    %58 = arith.addf %57, %56 : vector<8x128xf32>
    %59 = arith.divf %57, %58 : vector<8x128xf32>
    %60 = vector.extract_strided_slice %50 {offsets = [0, 128], sizes = [8, 128], strides = [1, 1]} : vector<8x384xf32> to vector<8x128xf32>
    %61 = vector.extract_strided_slice %51 {offsets = [0, 128], sizes = [8, 128], strides = [1, 1]} : vector<8x384xf32> to vector<8x128xf32>
    %62 = arith.addf %60, %61 : vector<8x128xf32>
    %63 = arith.negf %62 : vector<8x128xf32>
    %64 = math.exp %63 : vector<8x128xf32>
    %cst_20 = arith.constant 1.000000e+00 : f32
    %65 = vector.broadcast %cst_20 : f32 to vector<8x128xf32>
    %66 = arith.addf %65, %64 : vector<8x128xf32>
    %67 = arith.divf %65, %66 : vector<8x128xf32>
    %68 = vector.extract_strided_slice %50 {offsets = [0, 256], sizes = [8, 128], strides = [1, 1]} : vector<8x384xf32> to vector<8x128xf32>
    %69 = vector.extract_strided_slice %51 {offsets = [0, 256], sizes = [8, 128], strides = [1, 1]} : vector<8x384xf32> to vector<8x128xf32>
    %70 = vector.broadcast %5 : vector<1x128xf32> to vector<8x128xf32>
    %71 = arith.addf %69, %70 : vector<8x128xf32>
    %72 = arith.mulf %59, %71 : vector<8x128xf32>
    %73 = arith.addf %68, %72 : vector<8x128xf32>
    %74 = math.tanh %73 : vector<8x128xf32>
    %cst_21 = arith.constant 1.000000e+00 : f32
    %75 = vector.broadcast %cst_21 : f32 to vector<8x128xf32>
    %76 = arith.subf %75, %67 : vector<8x128xf32>
    %77 = arith.mulf %76, %74 : vector<8x128xf32>
    %78 = arith.mulf %67, %43 : vector<8x128xf32>
    %79 = arith.addf %77, %78 : vector<8x128xf32>
    %c2 = arith.constant 2 : index
    %c0_22 = arith.constant 0 : index
    %c0_23 = arith.constant 0 : index
    %80 = vector.load %arg2[%c2, %c0_22, %c0_23] : memref<8x8x1xf32, #tpu.memory_space<vmem>>, vector<1x8x1xf32>
    %81 = vector.shape_cast %80 : vector<1x8x1xf32> to vector<8x1xf32>
    %82 = vector.broadcast %81 : vector<8x1xf32> to vector<8x384xf32>
    %83 = vector.broadcast %6 : vector<1x384xf32> to vector<8x384xf32>
    %84 = arith.mulf %82, %83 : vector<8x384xf32>
    %85 = vector.broadcast %4 : vector<1x384xf32> to vector<8x384xf32>
    %86 = arith.addf %85, %84 : vector<8x384xf32>
    %cst_24 = arith.constant dense<0.000000e+00> : vector<8x384xf32>
    %87 = tpu.matmul %79, %3, %cst_24 {dimension_numbers = #tpu.dot_dimension_numbers<[1], [0], [0], [1], [0, 0, 1, 1], [], []>} : vector<8x128xf32>, vector<128x384xf32>, vector<8x384xf32> -> vector<8x384xf32>
    %88 = vector.extract_strided_slice %86 {offsets = [0, 0], sizes = [8, 128], strides = [1, 1]} : vector<8x384xf32> to vector<8x128xf32>
    %89 = vector.extract_strided_slice %87 {offsets = [0, 0], sizes = [8, 128], strides = [1, 1]} : vector<8x384xf32> to vector<8x128xf32>
    %90 = arith.addf %88, %89 : vector<8x128xf32>
    %91 = arith.negf %90 : vector<8x128xf32>
    %92 = math.exp %91 : vector<8x128xf32>
    %cst_25 = arith.constant 1.000000e+00 : f32
    %93 = vector.broadcast %cst_25 : f32 to vector<8x128xf32>
    %94 = arith.addf %93, %92 : vector<8x128xf32>
    %95 = arith.divf %93, %94 : vector<8x128xf32>
    %96 = vector.extract_strided_slice %86 {offsets = [0, 128], sizes = [8, 128], strides = [1, 1]} : vector<8x384xf32> to vector<8x128xf32>
    %97 = vector.extract_strided_slice %87 {offsets = [0, 128], sizes = [8, 128], strides = [1, 1]} : vector<8x384xf32> to vector<8x128xf32>
    %98 = arith.addf %96, %97 : vector<8x128xf32>
    %99 = arith.negf %98 : vector<8x128xf32>
    %100 = math.exp %99 : vector<8x128xf32>
    %cst_26 = arith.constant 1.000000e+00 : f32
    %101 = vector.broadcast %cst_26 : f32 to vector<8x128xf32>
    %102 = arith.addf %101, %100 : vector<8x128xf32>
    %103 = arith.divf %101, %102 : vector<8x128xf32>
    %104 = vector.extract_strided_slice %86 {offsets = [0, 256], sizes = [8, 128], strides = [1, 1]} : vector<8x384xf32> to vector<8x128xf32>
    %105 = vector.extract_strided_slice %87 {offsets = [0, 256], sizes = [8, 128], strides = [1, 1]} : vector<8x384xf32> to vector<8x128xf32>
    %106 = vector.broadcast %5 : vector<1x128xf32> to vector<8x128xf32>
    %107 = arith.addf %105, %106 : vector<8x128xf32>
    %108 = arith.mulf %95, %107 : vector<8x128xf32>
    %109 = arith.addf %104, %108 : vector<8x128xf32>
    %110 = math.tanh %109 : vector<8x128xf32>
    %cst_27 = arith.constant 1.000000e+00 : f32
    %111 = vector.broadcast %cst_27 : f32 to vector<8x128xf32>
    %112 = arith.subf %111, %103 : vector<8x128xf32>
    %113 = arith.mulf %112, %110 : vector<8x128xf32>
    %114 = arith.mulf %103, %79 : vector<8x128xf32>
    %115 = arith.addf %113, %114 : vector<8x128xf32>
    %c3 = arith.constant 3 : index
    %c0_28 = arith.constant 0 : index
    %c0_29 = arith.constant 0 : index
    %116 = vector.load %arg2[%c3, %c0_28, %c0_29] : memref<8x8x1xf32, #tpu.memory_space<vmem>>, vector<1x8x1xf32>
    %117 = vector.shape_cast %116 : vector<1x8x1xf32> to vector<8x1xf32>
    %118 = vector.broadcast %117 : vector<8x1xf32> to vector<8x384xf32>
    %119 = vector.broadcast %6 : vector<1x384xf32> to vector<8x384xf32>
    %120 = arith.mulf %118, %119 : vector<8x384xf32>
    %121 = vector.broadcast %4 : vector<1x384xf32> to vector<8x384xf32>
    %122 = arith.addf %121, %120 : vector<8x384xf32>
    %cst_30 = arith.constant dense<0.000000e+00> : vector<8x384xf32>
    %123 = tpu.matmul %115, %3, %cst_30 {dimension_numbers = #tpu.dot_dimension_numbers<[1], [0], [0], [1], [0, 0, 1, 1], [], []>} : vector<8x128xf32>, vector<128x384xf32>, vector<8x384xf32> -> vector<8x384xf32>
    %124 = vector.extract_strided_slice %122 {offsets = [0, 0], sizes = [8, 128], strides = [1, 1]} : vector<8x384xf32> to vector<8x128xf32>
    %125 = vector.extract_strided_slice %123 {offsets = [0, 0], sizes = [8, 128], strides = [1, 1]} : vector<8x384xf32> to vector<8x128xf32>
    %126 = arith.addf %124, %125 : vector<8x128xf32>
    %127 = arith.negf %126 : vector<8x128xf32>
    %128 = math.exp %127 : vector<8x128xf32>
    %cst_31 = arith.constant 1.000000e+00 : f32
    %129 = vector.broadcast %cst_31 : f32 to vector<8x128xf32>
    %130 = arith.addf %129, %128 : vector<8x128xf32>
    %131 = arith.divf %129, %130 : vector<8x128xf32>
    %132 = vector.extract_strided_slice %122 {offsets = [0, 128], sizes = [8, 128], strides = [1, 1]} : vector<8x384xf32> to vector<8x128xf32>
    %133 = vector.extract_strided_slice %123 {offsets = [0, 128], sizes = [8, 128], strides = [1, 1]} : vector<8x384xf32> to vector<8x128xf32>
    %134 = arith.addf %132, %133 : vector<8x128xf32>
    %135 = arith.negf %134 : vector<8x128xf32>
    %136 = math.exp %135 : vector<8x128xf32>
    %cst_32 = arith.constant 1.000000e+00 : f32
    %137 = vector.broadcast %cst_32 : f32 to vector<8x128xf32>
    %138 = arith.addf %137, %136 : vector<8x128xf32>
    %139 = arith.divf %137, %138 : vector<8x128xf32>
    %140 = vector.extract_strided_slice %122 {offsets = [0, 256], sizes = [8, 128], strides = [1, 1]} : vector<8x384xf32> to vector<8x128xf32>
    %141 = vector.extract_strided_slice %123 {offsets = [0, 256], sizes = [8, 128], strides = [1, 1]} : vector<8x384xf32> to vector<8x128xf32>
    %142 = vector.broadcast %5 : vector<1x128xf32> to vector<8x128xf32>
    %143 = arith.addf %141, %142 : vector<8x128xf32>
    %144 = arith.mulf %131, %143 : vector<8x128xf32>
    %145 = arith.addf %140, %144 : vector<8x128xf32>
    %146 = math.tanh %145 : vector<8x128xf32>
    %cst_33 = arith.constant 1.000000e+00 : f32
    %147 = vector.broadcast %cst_33 : f32 to vector<8x128xf32>
    %148 = arith.subf %147, %139 : vector<8x128xf32>
    %149 = arith.mulf %148, %146 : vector<8x128xf32>
    %150 = arith.mulf %139, %115 : vector<8x128xf32>
    %151 = arith.addf %149, %150 : vector<8x128xf32>
    %c4 = arith.constant 4 : index
    %c0_34 = arith.constant 0 : index
    %c0_35 = arith.constant 0 : index
    %152 = vector.load %arg2[%c4, %c0_34, %c0_35] : memref<8x8x1xf32, #tpu.memory_space<vmem>>, vector<1x8x1xf32>
    %153 = vector.shape_cast %152 : vector<1x8x1xf32> to vector<8x1xf32>
    %154 = vector.broadcast %153 : vector<8x1xf32> to vector<8x384xf32>
    %155 = vector.broadcast %6 : vector<1x384xf32> to vector<8x384xf32>
    %156 = arith.mulf %154, %155 : vector<8x384xf32>
    %157 = vector.broadcast %4 : vector<1x384xf32> to vector<8x384xf32>
    %158 = arith.addf %157, %156 : vector<8x384xf32>
    %cst_36 = arith.constant dense<0.000000e+00> : vector<8x384xf32>
    %159 = tpu.matmul %151, %3, %cst_36 {dimension_numbers = #tpu.dot_dimension_numbers<[1], [0], [0], [1], [0, 0, 1, 1], [], []>} : vector<8x128xf32>, vector<128x384xf32>, vector<8x384xf32> -> vector<8x384xf32>
    %160 = vector.extract_strided_slice %158 {offsets = [0, 0], sizes = [8, 128], strides = [1, 1]} : vector<8x384xf32> to vector<8x128xf32>
    %161 = vector.extract_strided_slice %159 {offsets = [0, 0], sizes = [8, 128], strides = [1, 1]} : vector<8x384xf32> to vector<8x128xf32>
    %162 = arith.addf %160, %161 : vector<8x128xf32>
    %163 = arith.negf %162 : vector<8x128xf32>
    %164 = math.exp %163 : vector<8x128xf32>
    %cst_37 = arith.constant 1.000000e+00 : f32
    %165 = vector.broadcast %cst_37 : f32 to vector<8x128xf32>
    %166 = arith.addf %165, %164 : vector<8x128xf32>
    %167 = arith.divf %165, %166 : vector<8x128xf32>
    %168 = vector.extract_strided_slice %158 {offsets = [0, 128], sizes = [8, 128], strides = [1, 1]} : vector<8x384xf32> to vector<8x128xf32>
    %169 = vector.extract_strided_slice %159 {offsets = [0, 128], sizes = [8, 128], strides = [1, 1]} : vector<8x384xf32> to vector<8x128xf32>
    %170 = arith.addf %168, %169 : vector<8x128xf32>
    %171 = arith.negf %170 : vector<8x128xf32>
    %172 = math.exp %171 : vector<8x128xf32>
    %cst_38 = arith.constant 1.000000e+00 : f32
    %173 = vector.broadcast %cst_38 : f32 to vector<8x128xf32>
    %174 = arith.addf %173, %172 : vector<8x128xf32>
    %175 = arith.divf %173, %174 : vector<8x128xf32>
    %176 = vector.extract_strided_slice %158 {offsets = [0, 256], sizes = [8, 128], strides = [1, 1]} : vector<8x384xf32> to vector<8x128xf32>
    %177 = vector.extract_strided_slice %159 {offsets = [0, 256], sizes = [8, 128], strides = [1, 1]} : vector<8x384xf32> to vector<8x128xf32>
    %178 = vector.broadcast %5 : vector<1x128xf32> to vector<8x128xf32>
    %179 = arith.addf %177, %178 : vector<8x128xf32>
    %180 = arith.mulf %167, %179 : vector<8x128xf32>
    %181 = arith.addf %176, %180 : vector<8x128xf32>
    %182 = math.tanh %181 : vector<8x128xf32>
    %cst_39 = arith.constant 1.000000e+00 : f32
    %183 = vector.broadcast %cst_39 : f32 to vector<8x128xf32>
    %184 = arith.subf %183, %175 : vector<8x128xf32>
    %185 = arith.mulf %184, %182 : vector<8x128xf32>
    %186 = arith.mulf %175, %151 : vector<8x128xf32>
    %187 = arith.addf %185, %186 : vector<8x128xf32>
    %c5 = arith.constant 5 : index
    %c0_40 = arith.constant 0 : index
    %c0_41 = arith.constant 0 : index
    %188 = vector.load %arg2[%c5, %c0_40, %c0_41] : memref<8x8x1xf32, #tpu.memory_space<vmem>>, vector<1x8x1xf32>
    %189 = vector.shape_cast %188 : vector<1x8x1xf32> to vector<8x1xf32>
    %190 = vector.broadcast %189 : vector<8x1xf32> to vector<8x384xf32>
    %191 = vector.broadcast %6 : vector<1x384xf32> to vector<8x384xf32>
    %192 = arith.mulf %190, %191 : vector<8x384xf32>
    %193 = vector.broadcast %4 : vector<1x384xf32> to vector<8x384xf32>
    %194 = arith.addf %193, %192 : vector<8x384xf32>
    %cst_42 = arith.constant dense<0.000000e+00> : vector<8x384xf32>
    %195 = tpu.matmul %187, %3, %cst_42 {dimension_numbers = #tpu.dot_dimension_numbers<[1], [0], [0], [1], [0, 0, 1, 1], [], []>} : vector<8x128xf32>, vector<128x384xf32>, vector<8x384xf32> -> vector<8x384xf32>
    %196 = vector.extract_strided_slice %194 {offsets = [0, 0], sizes = [8, 128], strides = [1, 1]} : vector<8x384xf32> to vector<8x128xf32>
    %197 = vector.extract_strided_slice %195 {offsets = [0, 0], sizes = [8, 128], strides = [1, 1]} : vector<8x384xf32> to vector<8x128xf32>
    %198 = arith.addf %196, %197 : vector<8x128xf32>
    %199 = arith.negf %198 : vector<8x128xf32>
    %200 = math.exp %199 : vector<8x128xf32>
    %cst_43 = arith.constant 1.000000e+00 : f32
    %201 = vector.broadcast %cst_43 : f32 to vector<8x128xf32>
    %202 = arith.addf %201, %200 : vector<8x128xf32>
    %203 = arith.divf %201, %202 : vector<8x128xf32>
    %204 = vector.extract_strided_slice %194 {offsets = [0, 128], sizes = [8, 128], strides = [1, 1]} : vector<8x384xf32> to vector<8x128xf32>
    %205 = vector.extract_strided_slice %195 {offsets = [0, 128], sizes = [8, 128], strides = [1, 1]} : vector<8x384xf32> to vector<8x128xf32>
    %206 = arith.addf %204, %205 : vector<8x128xf32>
    %207 = arith.negf %206 : vector<8x128xf32>
    %208 = math.exp %207 : vector<8x128xf32>
    %cst_44 = arith.constant 1.000000e+00 : f32
    %209 = vector.broadcast %cst_44 : f32 to vector<8x128xf32>
    %210 = arith.addf %209, %208 : vector<8x128xf32>
    %211 = arith.divf %209, %210 : vector<8x128xf32>
    %212 = vector.extract_strided_slice %194 {offsets = [0, 256], sizes = [8, 128], strides = [1, 1]} : vector<8x384xf32> to vector<8x128xf32>
    %213 = vector.extract_strided_slice %195 {offsets = [0, 256], sizes = [8, 128], strides = [1, 1]} : vector<8x384xf32> to vector<8x128xf32>
    %214 = vector.broadcast %5 : vector<1x128xf32> to vector<8x128xf32>
    %215 = arith.addf %213, %214 : vector<8x128xf32>
    %216 = arith.mulf %203, %215 : vector<8x128xf32>
    %217 = arith.addf %212, %216 : vector<8x128xf32>
    %218 = math.tanh %217 : vector<8x128xf32>
    %cst_45 = arith.constant 1.000000e+00 : f32
    %219 = vector.broadcast %cst_45 : f32 to vector<8x128xf32>
    %220 = arith.subf %219, %211 : vector<8x128xf32>
    %221 = arith.mulf %220, %218 : vector<8x128xf32>
    %222 = arith.mulf %211, %187 : vector<8x128xf32>
    %223 = arith.addf %221, %222 : vector<8x128xf32>
    %c6 = arith.constant 6 : index
    %c0_46 = arith.constant 0 : index
    %c0_47 = arith.constant 0 : index
    %224 = vector.load %arg2[%c6, %c0_46, %c0_47] : memref<8x8x1xf32, #tpu.memory_space<vmem>>, vector<1x8x1xf32>
    %225 = vector.shape_cast %224 : vector<1x8x1xf32> to vector<8x1xf32>
    %226 = vector.broadcast %225 : vector<8x1xf32> to vector<8x384xf32>
    %227 = vector.broadcast %6 : vector<1x384xf32> to vector<8x384xf32>
    %228 = arith.mulf %226, %227 : vector<8x384xf32>
    %229 = vector.broadcast %4 : vector<1x384xf32> to vector<8x384xf32>
    %230 = arith.addf %229, %228 : vector<8x384xf32>
    %cst_48 = arith.constant dense<0.000000e+00> : vector<8x384xf32>
    %231 = tpu.matmul %223, %3, %cst_48 {dimension_numbers = #tpu.dot_dimension_numbers<[1], [0], [0], [1], [0, 0, 1, 1], [], []>} : vector<8x128xf32>, vector<128x384xf32>, vector<8x384xf32> -> vector<8x384xf32>
    %232 = vector.extract_strided_slice %230 {offsets = [0, 0], sizes = [8, 128], strides = [1, 1]} : vector<8x384xf32> to vector<8x128xf32>
    %233 = vector.extract_strided_slice %231 {offsets = [0, 0], sizes = [8, 128], strides = [1, 1]} : vector<8x384xf32> to vector<8x128xf32>
    %234 = arith.addf %232, %233 : vector<8x128xf32>
    %235 = arith.negf %234 : vector<8x128xf32>
    %236 = math.exp %235 : vector<8x128xf32>
    %cst_49 = arith.constant 1.000000e+00 : f32
    %237 = vector.broadcast %cst_49 : f32 to vector<8x128xf32>
    %238 = arith.addf %237, %236 : vector<8x128xf32>
    %239 = arith.divf %237, %238 : vector<8x128xf32>
    %240 = vector.extract_strided_slice %230 {offsets = [0, 128], sizes = [8, 128], strides = [1, 1]} : vector<8x384xf32> to vector<8x128xf32>
    %241 = vector.extract_strided_slice %231 {offsets = [0, 128], sizes = [8, 128], strides = [1, 1]} : vector<8x384xf32> to vector<8x128xf32>
    %242 = arith.addf %240, %241 : vector<8x128xf32>
    %243 = arith.negf %242 : vector<8x128xf32>
    %244 = math.exp %243 : vector<8x128xf32>
    %cst_50 = arith.constant 1.000000e+00 : f32
    %245 = vector.broadcast %cst_50 : f32 to vector<8x128xf32>
    %246 = arith.addf %245, %244 : vector<8x128xf32>
    %247 = arith.divf %245, %246 : vector<8x128xf32>
    %248 = vector.extract_strided_slice %230 {offsets = [0, 256], sizes = [8, 128], strides = [1, 1]} : vector<8x384xf32> to vector<8x128xf32>
    %249 = vector.extract_strided_slice %231 {offsets = [0, 256], sizes = [8, 128], strides = [1, 1]} : vector<8x384xf32> to vector<8x128xf32>
    %250 = vector.broadcast %5 : vector<1x128xf32> to vector<8x128xf32>
    %251 = arith.addf %249, %250 : vector<8x128xf32>
    %252 = arith.mulf %239, %251 : vector<8x128xf32>
    %253 = arith.addf %248, %252 : vector<8x128xf32>
    %254 = math.tanh %253 : vector<8x128xf32>
    %cst_51 = arith.constant 1.000000e+00 : f32
    %255 = vector.broadcast %cst_51 : f32 to vector<8x128xf32>
    %256 = arith.subf %255, %247 : vector<8x128xf32>
    %257 = arith.mulf %256, %254 : vector<8x128xf32>
    %258 = arith.mulf %247, %223 : vector<8x128xf32>
    %259 = arith.addf %257, %258 : vector<8x128xf32>
    %c7 = arith.constant 7 : index
    %c0_52 = arith.constant 0 : index
    %c0_53 = arith.constant 0 : index
    %260 = vector.load %arg2[%c7, %c0_52, %c0_53] : memref<8x8x1xf32, #tpu.memory_space<vmem>>, vector<1x8x1xf32>
    %261 = vector.shape_cast %260 : vector<1x8x1xf32> to vector<8x1xf32>
    %262 = vector.broadcast %261 : vector<8x1xf32> to vector<8x384xf32>
    %263 = vector.broadcast %6 : vector<1x384xf32> to vector<8x384xf32>
    %264 = arith.mulf %262, %263 : vector<8x384xf32>
    %265 = vector.broadcast %4 : vector<1x384xf32> to vector<8x384xf32>
    %266 = arith.addf %265, %264 : vector<8x384xf32>
    %cst_54 = arith.constant dense<0.000000e+00> : vector<8x384xf32>
    %267 = tpu.matmul %259, %3, %cst_54 {dimension_numbers = #tpu.dot_dimension_numbers<[1], [0], [0], [1], [0, 0, 1, 1], [], []>} : vector<8x128xf32>, vector<128x384xf32>, vector<8x384xf32> -> vector<8x384xf32>
    %268 = vector.extract_strided_slice %266 {offsets = [0, 0], sizes = [8, 128], strides = [1, 1]} : vector<8x384xf32> to vector<8x128xf32>
    %269 = vector.extract_strided_slice %267 {offsets = [0, 0], sizes = [8, 128], strides = [1, 1]} : vector<8x384xf32> to vector<8x128xf32>
    %270 = arith.addf %268, %269 : vector<8x128xf32>
    %271 = arith.negf %270 : vector<8x128xf32>
    %272 = math.exp %271 : vector<8x128xf32>
    %cst_55 = arith.constant 1.000000e+00 : f32
    %273 = vector.broadcast %cst_55 : f32 to vector<8x128xf32>
    %274 = arith.addf %273, %272 : vector<8x128xf32>
    %275 = arith.divf %273, %274 : vector<8x128xf32>
    %276 = vector.extract_strided_slice %266 {offsets = [0, 128], sizes = [8, 128], strides = [1, 1]} : vector<8x384xf32> to vector<8x128xf32>
    %277 = vector.extract_strided_slice %267 {offsets = [0, 128], sizes = [8, 128], strides = [1, 1]} : vector<8x384xf32> to vector<8x128xf32>
    %278 = arith.addf %276, %277 : vector<8x128xf32>
    %279 = arith.negf %278 : vector<8x128xf32>
    %280 = math.exp %279 : vector<8x128xf32>
    %cst_56 = arith.constant 1.000000e+00 : f32
    %281 = vector.broadcast %cst_56 : f32 to vector<8x128xf32>
    %282 = arith.addf %281, %280 : vector<8x128xf32>
    %283 = arith.divf %281, %282 : vector<8x128xf32>
    %284 = vector.extract_strided_slice %266 {offsets = [0, 256], sizes = [8, 128], strides = [1, 1]} : vector<8x384xf32> to vector<8x128xf32>
    %285 = vector.extract_strided_slice %267 {offsets = [0, 256], sizes = [8, 128], strides = [1, 1]} : vector<8x384xf32> to vector<8x128xf32>
    %286 = vector.broadcast %5 : vector<1x128xf32> to vector<8x128xf32>
    %287 = arith.addf %285, %286 : vector<8x128xf32>
    %288 = arith.mulf %275, %287 : vector<8x128xf32>
    %289 = arith.addf %284, %288 : vector<8x128xf32>
    %290 = math.tanh %289 : vector<8x128xf32>
    %cst_57 = arith.constant 1.000000e+00 : f32
    %291 = vector.broadcast %cst_57 : f32 to vector<8x128xf32>
    %292 = arith.subf %291, %283 : vector<8x128xf32>
    %293 = arith.mulf %292, %290 : vector<8x128xf32>
    %294 = arith.mulf %283, %259 : vector<8x128xf32>
    %295 = arith.addf %293, %294 : vector<8x128xf32>
    %c0_58 = arith.constant 0 : index
    %c0_59 = arith.constant 0 : index
    %296 = vector.load %arg16[%c0_58, %c0_59] : memref<8x128xf32, #tpu.memory_space<vmem>>, vector<8x128xf32>
    tpu.vector_store %arg16[%c0_58, %c0_59], %295 {strides = array<i32>} : memref<8x128xf32, #tpu.memory_space<vmem>>, vector<8x128xf32>,
    %c0_i32_60 = arith.constant 0 : i32
    %297 = arith.cmpi eq, %arg1, %c0_i32_60 : i32
    %298 = arith.extui %297 : i1 to i32
    %c0_i32_61 = arith.constant 0 : i32
    %299 = arith.cmpi ne, %298, %c0_i32_61 : i32
    scf.if %299 {
      %c0_62 = arith.constant 0 : index
      %c0_63 = arith.constant 0 : index
      %300 = vector.load %arg14[%c0_62, %c0_63] : memref<128x128xf32, #tpu.memory_space<vmem>>, vector<128x128xf32>
      %cst_64 = arith.constant dense<0.000000e+00> : vector<8x128xf32>
      %301 = tpu.matmul %295, %300, %cst_64 {dimension_numbers = #tpu.dot_dimension_numbers<[1], [0], [0], [1], [0, 0, 1, 1], [], []>} : vector<8x128xf32>, vector<128x128xf32>, vector<8x128xf32> -> vector<8x128xf32>
      %c0_65 = arith.constant 0 : index
      %c0_66 = arith.constant 0 : index
      %302 = vector.load %arg15[%c0_65, %c0_66] : memref<1x128xf32, #tpu.memory_space<vmem>>, vector<1x128xf32>
      %303 = vector.broadcast %302 : vector<1x128xf32> to vector<8x128xf32>
      %304 = arith.addf %301, %303 : vector<8x128xf32>
      %c0_67 = arith.constant 0 : index
      %c0_68 = arith.constant 0 : index
      %305 = vector.load %arg9[%c0_67, %c0_68] : memref<8x128xf32, #tpu.memory_space<vmem>>, vector<8x128xf32>
      tpu.vector_store %arg9[%c0_67, %c0_68], %304 {strides = array<i32>} : memref<8x128xf32, #tpu.memory_space<vmem>>, vector<8x128xf32>,
    } else {
    }
    return
  }
  func.func @transform_0(%arg0: i32, %arg1: i32) -> (i32, i32, i32) {
    %c0_i32 = arith.constant 0 : i32
    %c0_i32_0 = arith.constant 0 : i32
    return %arg1, %arg0, %c0_i32 : i32, i32, i32
  }
  func.func @transform_7(%arg0: i32, %arg1: i32) -> (i32, i32) {
    %c0_i32 = arith.constant 0 : i32
    %c0_i32_0 = arith.constant 0 : i32
    return %arg0, %c0_i32 : i32, i32
  }
}

</mosaic_0001>

<bundles_post_ra>
// kernel: tpu_custom_call.1
= control target key start
LH: loop header
LB: loop body
LE: loop exit
PB: predicated region body
PF: predicated region fallthrough
CT: control target
= control target key end

     0   :  { %12 = vsyncpa [#allocation10], 0  ;;  %s3584_s0 = inlined_call_operand.vmem [shape: f32[8,8,1], index: 0, kind: input, shape index: {}]   ;;  %s3585_s1 = inlined_call_operand.vmem [shape: f32[1,384], index: 1, kind: input, shape index: {}]   ;;  %s3586_s2 = inlined_call_operand.hbm [shape: f32[128,384], index: 2, kind: input, shape index: {}]   ;;  %s3587_s3 = inlined_call_operand.vmem [shape: f32[1,384], index: 3, kind: input, shape index: {}]   ;;  %s3588_s4 = inlined_call_operand.vmem [shape: f32[1,128], index: 4, kind: input, shape index: {}]   ;;  %s3589_s5 = inlined_call_operand.hbm [shape: f32[128,128], index: 5, kind: input, shape index: {}]   ;;  %s3590_s6 = inlined_call_operand.vmem [shape: f32[1,128], index: 6, kind: input, shape index: {}]   ;;  %s3591_s7 = inlined_call_operand.hbm [shape: f32[8,128], index: 7, kind: output, shape index: {}]  }
   0x1   :  { %v36_v0 = vld [vmem:[%s3585_s1] sm:$0x7] }
   0x2   :  { %37 = vst [vmem:[#allocation2] sm:$0x7] %v36_v0 }
   0x3   :  { %62 = vsyncadd [#allocation11], 48 }
   0x4   :  { %3006 = dma.done.wait [#allocation11], 48 }
   0x5   :  { %3007 = vsyncadd [#allocation11], 4294967248 }
   0x6   :  { %s3020_s26 = smov [#allocation3]   ;;  %s2940_s30 = scalar_lea.hbm %s3586_s2, 6144 }
   0x7   :  { %s73_s27 = sshll.u32 %s3020_s26, 4  ;;  %p2941_p0 = scmp.ne.s32.totalorder %s3586_s2, %s2940_s30  ;;  %s74_s27 = int_to_ptr.vmem [resolvable:$true] %s73_s27 }
   0x8   :  { %p2944_p1 = scmp.lt.u32.totalorder %s2940_s30, %s3586_s2 }
   0xa   :  { %p2946_p2 = pnand %p2944_p1, %p2941_p0 }
   0xc   :  { %2949 = shalt.err (!%p2946_p2)  }
   0xd   :  { %s2950_s1 = scalar_lea.vmem %s74_s27, 6144  ;;  %p2955_p4 = scmp.lt.s32.totalorder %s74_s27, %s74_s27 }
   0xe   :  { %p2951_p3 = scmp.ne.s32.totalorder %s74_s27, %s2950_s1  ;;  %p2956_p5 = scmp.lt.s32.totalorder %s2950_s1, %s2950_s1 }
  0x10   :  { %p2957_p6 = por %p2956_p5, %p2955_p4 }
  0x12   :  { %p2958_p7 = pnand %p2957_p6, %p2951_p3 }
  0x14   :  { %2961 = shalt.err (!%p2958_p7)  }
  0x15   :  { %76 = dma.hbm_to_vmem [thread:$0]  %s3586_s2, 6144, %s74_s27, [#allocation13] }
  0x16   :  { %3008 = dma.done.wait [#allocation13], 6144 }
  0x17   :  { %3009 = vsyncadd [#allocation13], 4294961152 }
  0x18   :  { %v98_v1 = vld [vmem:[%s3587_s3] sm:$0x7] }
  0x19   :  { %99 = vst [vmem:[#allocation4] sm:$0x7] %v98_v1 }
  0x1a   :  { %124 = vsyncadd [#allocation18], 48 }
  0x1b   :  { %3010 = dma.done.wait [#allocation18], 48 }
  0x1c   :  { %3011 = vsyncadd [#allocation18], 4294967248 }
  0x1d   :  { %v145_v2 = vld [vmem:[%s3588_s4] sm:$0x1] }
  0x1e   :  { %146 = vst [vmem:[#allocation5] sm:$0x1] %v145_v2 }
  0x1f   :  { %171 = vsyncadd [#allocation20], 16 }
  0x20   :  { %3012 = dma.done.wait [#allocation20], 16 }
  0x21   :  { %3013 = vsyncadd [#allocation20], 4294967280 }
  0x22   :  { %s3021_s18 = smov [#allocation6]   ;;  %s2962_s21 = scalar_lea.hbm %s3589_s5, 2048 }
  0x23   :  { %s182_s2 = sshll.u32 %s3021_s18, 4  ;;  %p2963_p8 = scmp.ne.s32.totalorder %s3589_s5, %s2962_s21  ;;  %s183_s2 = int_to_ptr.vmem [resolvable:$true] %s182_s2 }
  0x24   :  { %p2966_p9 = scmp.lt.u32.totalorder %s2962_s21, %s3589_s5 }
  0x26   :  { %p2968_p10 = pnand %p2966_p9, %p2963_p8 }
  0x28   :  { %2971 = shalt.err (!%p2968_p10)  }
  0x29   :  { %s2972_s4 = scalar_lea.vmem %s183_s2, 2048  ;;  %p2977_p12 = scmp.lt.s32.totalorder %s183_s2, %s183_s2 }
  0x2a   :  { %p2973_p11 = scmp.ne.s32.totalorder %s183_s2, %s2972_s4  ;;  %p2978_p13 = scmp.lt.s32.totalorder %s2972_s4, %s2972_s4 }
  0x2c   :  { %p2979_p0 = por %p2978_p13, %p2977_p12 }
  0x2e   :  { %p2980_p1 = pnand %p2979_p0, %p2973_p11 }
  0x30   :  { %2983 = shalt.err (!%p2980_p1)  }
  0x31   :  { %185 = dma.hbm_to_vmem [thread:$0]  %s3589_s5, 2048, %s183_s2, [#allocation22] }
  0x32   :  { %3014 = dma.done.wait [#allocation22], 2048 }
  0x33   :  { %3015 = vsyncadd [#allocation22], 4294965248 }
  0x34   :  { %v206_v3 = vld [vmem:[%s3590_s6] sm:$0x1] }
  0x35   :  { %207 = vst [vmem:[#allocation7] sm:$0x1] %v206_v3 }
  0x36   :  { %232 = vsyncadd [#allocation25], 16 }
  0x37   :  { %3016 = dma.done.wait [#allocation25], 16 }
  0x38   :  { %3017 = vsyncadd [#allocation25], 4294967280  ;;  %v238_v4 = vld [vmem:[#allocation3 + $0x8] sm:$0xff]  ;;  %v241_v5 = vld [vmem:[#allocation3 + $0x20] sm:$0xff]  ;;  %v3022_v11 = vmov 0.0|0.0   ;;  %v3023_v12 = vmov 0.0  }
  0x39   :  { %v237_v6 = vld [vmem:[#allocation3] sm:$0xff]  ;;  %v3103_v7 = vpack.c.bf16 %v241_v5, %v238_v4  ;;  %v240_v8 = vld [vmem:[#allocation3 + $0x18] sm:$0xff]  ;;  %v247_v10 = vld [vmem:[#allocation3 + $0x50] sm:$0xff]  ;;  %2411 = vmatprep.subr.bf16.mxu1 %v3022_v11  ;;  %397 = vmatprep.mubr.f32.mxu0 %v3023_v12  ;;  %vm3024_vm0 = vmmov 0   ;;  %v3025_v18 = vmov 0  }
  0x3a   :  { %v244_v9 = vld [vmem:[#allocation3 + $0x38] sm:$0xff]  ;;  %v3107_v13 = vpack.c.bf16 %v240_v8, %v237_v6  ;;  %v243_v15 = vld [vmem:[#allocation3 + $0x30] sm:$0xff]  ;;  %v246_v16 = vld [vmem:[#allocation3 + $0x48] sm:$0xff]  ;;  %2096 = vmatprep.mubr.msk.f32.mxu1 %vm3024_vm0, %v3023_v12  ;;  %2858 = vset.pattern.permute.xlu0 %v3025_v18 }
  0x3b   :  { %v3109_v14 = vpack.c.bf16 %v247_v10, %v244_v9  ;;  %v250_v17 = vld [vmem:[#allocation3 + $0x68] sm:$0xff]  ;;  %2380 = vmatprep.subr.bf16.mxu0 %v3103_v7  ;;  %v253_v19 = vld [vmem:[#allocation3 + $0x80] sm:$0xff]  ;;  %2859 = vset.pattern.permute.xlu1 %v3025_v18  ;;  %v3115_v20 = vpack.c.bf16 %v246_v16, %v243_v15  ;;  %v252_v23 = vld [vmem:[#allocation3 + $0x78] sm:$0xff] }
  0x3c   :  { %2382 = vmatpush1.bf16.msra.mxu0 %v3107_v13  ;;  %v3118_v21 = vpack.c.bf16 %v253_v19, %v250_v17  ;;  %v249_v22 = vld [vmem:[#allocation3 + $0x60] sm:$0xff]  ;;  %v256_v24 = vld [vmem:[#allocation3 + $0x98] sm:$0xff]  ;;  %v259_v25 = vld [vmem:[#allocation3 + $0xb0] sm:$0xff] }
  0x3d   :  { %2384 = vmatprep.subr.bf16.mxu0 %v3109_v14  ;;  %v3121_v26 = vpack.c.bf16 %v252_v23, %v249_v22  ;;  %v255_v27 = vld [vmem:[#allocation3 + $0x90] sm:$0xff]  ;;  %v3124_v28 = vpack.c.bf16 %v259_v25, %v256_v24  ;;  %v258_v29 = vld [vmem:[#allocation3 + $0xa8] sm:$0xff]  ;;  %v265_v33 = vld [vmem:[#allocation3 + $0xe0] sm:$0xff] }
  0x3e   :  { %v239_v30 = vld [vmem:[#allocation3 + $0x10] sm:$0xff]  ;;  %v242_v31 = vld [vmem:[#allocation3 + $0x28] sm:$0xff]  ;;  %v245_v35 = vld [vmem:[#allocation3 + $0x40] sm:$0xff]  ;;  %v3129_v37 = vpack.c.bf16 %v258_v29, %v255_v27  ;;  %v296_v27 = vlaneseq }
  0x3f   :  { %v262_v32 = vld [vmem:[#allocation3 + $0xc8] sm:$0xff]  ;;  %v3126_v34 = vpack.c.bf16 %v242_v31, %v239_v30  ;;  %v248_v36 = vld [vmem:[#allocation3 + $0x58] sm:$0xff]  ;;  %v261_v38 = vld [vmem:[#allocation3 + $0xc0] sm:$0xff] }
  0x40   :  { %2386 = vmatpush1.bf16.msra.mxu0 %v3115_v20  ;;  %v3132_v39 = vpack.c.bf16 %v248_v36, %v245_v35  ;;  %v3135_v40 = vpack.c.bf16 %v265_v33, %v262_v32  ;;  %v264_v41 = vld [vmem:[#allocation3 + $0xd8] sm:$0xff]  ;;  %v251_v42 = vld [vmem:[#allocation3 + $0x70] sm:$0xff]  ;;  %v254_v43 = vld [vmem:[#allocation3 + $0x88] sm:$0xff]  ;;  %v297_v29 = vshrl.u32 %v296_v27, 7 }
  0x41   :  { %2388 = vmatprep.subr.bf16.mxu0 %v3118_v21  ;;  %2413 = vmatpush3.bf16.msra.mxu1 %v3126_v34  ;;  %v268_v44 = vld [vmem:[#allocation3 + $0xf8] sm:$0xff]  ;;  %v271_v45 = vld [vmem:[#allocation3 + $0x110] sm:$0xff]  ;;  %v3139_v46 = vpack.c.bf16 %v264_v41, %v261_v38  ;;  %v3142_v48 = vpack.c.bf16 %v254_v43, %v251_v42  ;;  %v270_v51 = vld [vmem:[#allocation3 + $0x108] sm:$0xff] }
  0x42   :  { %2414 = vmatprep.subr.bf16.mxu1 %v3022_v11  ;;  %v267_v47 = vld [vmem:[#allocation3 + $0xf0] sm:$0xff]  ;;  %v289_v49 = vld [vmem:[%s3584_s0] sm:$0xff]  ;;  %v3148_v50 = vpack.c.bf16 %v271_v45, %v268_v44  ;;  %v274_v54 = vld [vmem:[#allocation3 + $0x128] sm:$0xff]  ;;  %v298_v30 = vsub.s32 0, %v297_v29  ;;  %v302_v32 = vsub.s32 1, %v297_v29 }
  0x43   :  { %v257_v52 = vld [vmem:[#allocation3 + $0xa0] sm:$0xff]  ;;  %v260_v53 = vld [vmem:[#allocation3 + $0xb8] sm:$0xff]  ;;  %292 = vperm.xlu0 %2858, %v289_v49   ;;  %v3155_v57 = vpack.c.bf16 %v270_v51, %v267_v47  ;;  %v263_v62 = vld [vmem:[#allocation3 + $0xd0] sm:$0xff] }
  0x44   :  { %2390 = vmatpush1.bf16.msra.mxu0 %v3121_v26  ;;  %v277_v55 = vld [vmem:[#allocation3 + $0x140] sm:$0xff]  ;;  %v3158_v59 = vpack.c.bf16 %v260_v53, %v257_v52  ;;  %v276_v61 = vld [vmem:[#allocation3 + $0x138] sm:$0xff]  ;;  %v266_v63 = vld [vmem:[#allocation3 + $0xe8] sm:$0xff] }
  0x45   :  { %2392 = vmatprep.subr.bf16.mxu0 %v3124_v28  ;;  %2416 = vmatpush3.bf16.msra.mxu1 %v3132_v39  ;;  %v1889_v56 = vld [vmem:[%s3584_s0 + $0x8] sm:$0xff]  ;;  %v3161_v60 = vpack.c.bf16 %v277_v55, %v274_v54  ;;  %v280_v0 = vld [vmem:[#allocation3 + $0x158] sm:$0xff]  ;;  %v283_v1 = vld [vmem:[#allocation3 + $0x170] sm:$0xff]  ;;  %v3171_v5 = vpack.c.bf16 %v266_v63, %v263_v62  ;;  %v306_v63 = vsub.s32 2, %v297_v29 }
  0x46   :  { %2417 = vmatprep.subr.bf16.mxu1 %v3022_v11  ;;  %v273_v58 = vld [vmem:[#allocation3 + $0x120] sm:$0xff]  ;;  %v279_v4 = vld [vmem:[#allocation3 + $0x150] sm:$0xff]  ;;  %v3174_v6 = vpack.c.bf16 %v283_v1, %v280_v0  ;;  %v282_v8 = vld [vmem:[#allocation3 + $0x168] sm:$0xff] }
  0x47   :  { %506 = vperm.xlu0 %2858, %v1889_v56   ;;  %v1898_v2 = vld [vmem:[%s3584_s0 + $0x20] sm:$0xff]  ;;  %v3168_v3 = vpack.c.bf16 %v276_v61, %v273_v58  ;;  %v1904_v15 = vld [vmem:[%s3584_s0 + $0x30] sm:$0xff]  ;;  %v3181_v16 = vpack.c.bf16 %v282_v8, %v279_v4 }
  0x48   :  { %2394 = vmatpush1.bf16.msra.mxu0 %v3129_v37  ;;  %v269_v9 = vld [vmem:[#allocation3 + $0x100] sm:$0xff]  ;;  %v272_v10 = vld [vmem:[#allocation3 + $0x118] sm:$0xff]  ;;  %v275_v18 = vld [vmem:[#allocation3 + $0x130] sm:$0xff] }
  0x49   :  { %2396 = vmatprep.subr.bf16.mxu0 %v3135_v40  ;;  %2419 = vmatpush3.bf16.msra.mxu1 %v3142_v48  ;;  %v3184_v17 = vpack.c.bf16 %v272_v10, %v269_v9  ;;  %v278_v19 = vld [vmem:[#allocation3 + $0x148] sm:$0xff]  ;;  %v281_v23 = vld [vmem:[#allocation3 + $0x160] sm:$0xff]  ;;  %v284_v24 = vld [vmem:[#allocation3 + $0x178] sm:$0xff] }
  0x4a   :  { %2420 = vmatprep.subr.bf16.mxu1 %v3022_v11  ;;  %v3190_v22 = vpack.c.bf16 %v278_v19, %v275_v18  ;;  %v3196_v25 = vpack.c.bf16 %v284_v24, %v281_v23  ;;  %v287_v31 = vld [vmem:[#allocation2] sm:$0x7]  ;;  %v285_v35 = vld [vmem:[#allocation4] sm:$0x7] }
  0x4b   :  { %1034 = vperm.xlu0 %2858, %v1898_v2   ;;  %v3237_v33 = vrot.slane %v287_v31, %v298_v30  ;;  %v3239_v38 = vrot.slane %v287_v31, %v302_v32  ;;  %v3242_v42 = vrot.slane %v285_v35, %v298_v30  ;;  %v3245_v44 = vrot.slane %v285_v35, %v302_v32  ;;  %v3251_v2 = vld [vmem:[#allocation5] ss:$0 sm:$0xff] }
  0x4c   :  { %2398 = vmatpush1.bf16.msra.mxu0 %v3139_v46  ;;  %v3249_v0 = vrot.slane %v287_v31, %v306_v63  ;;  %v3254_v8 = vrot.slane %v285_v35, %v306_v63  ;;  %v1892_v35 = vld [vmem:[%s3584_s0 + $0x10] sm:$0xff] }
  0x4d   :  { %2400 = vmatprep.subr.bf16.mxu0 %v3148_v50  ;;  %2422 = vmatpush3.bf16.msra.mxu1 %v3158_v59 }
  0x4e   :  { %2423 = vmatprep.subr.bf16.mxu1 %v3022_v11  ;;  %682 = vperm.xlu1 %2859, %v1892_v35  }
  0x4f   :  { %1386 = vperm.xlu0 %2858, %v1904_v15  }
  0x50   :  { %2402 = vmatpush1.bf16.msra.mxu0 %v3155_v57 }
  0x51   :  { %2404 = vmatprep.subr.bf16.mxu0 %v3161_v60  ;;  %2425 = vmatpush3.bf16.msra.mxu1 %v3171_v5 }
  0x52   :  { %2426 = vmatprep.subr.bf16.mxu1 %v3022_v11 }
  0x54   :  { %2406 = vmatpush1.bf16.msra.mxu0 %v3168_v3 }
  0x55   :  { %2408 = vmatprep.subr.bf16.mxu0 %v3174_v6  ;;  %2428 = vmatpush3.bf16.msra.mxu1 %v3184_v17 }
  0x56   :  { %2429 = vmatprep.subr.bf16.mxu1 %v3022_v11 }
  0x58   :  { %2410 = vmatpush1.bf16.msra.mxu0 %v3181_v16 }
  0x59   :  { %2436 = vmatprep.subr.bf16.mxu0 %v3103_v7  ;;  %2431 = vmatpush3.bf16.msra.mxu1 %v3190_v22 }
  0x5a   :  { %2432 = vmatprep.subr.bf16.mxu1 %v3022_v11 }
  0x5b   :  { %398 = vmatmul.mubr.f32.vlgmr.msra.gmra.mrb[0].mxu0 %v3023_v12 }
  0x5c   :  { %2438 = vmatpush1.bf16.msra.mxu0 %v3107_v13  ;;  %579 = vmatprep.mubr.f32.mxu0 %v3023_v12 }
  0x5d   :  { %2440 = vmatprep.subr.bf16.mxu0 %v3109_v14  ;;  %2434 = vmatpush3.bf16.msra.mxu1 %v3196_v25 }
  0x5e   :  { %2467 = vmatprep.subr.bf16.mxu1 %v3022_v11 }
  0x60   :  { %2442 = vmatpush1.bf16.msra.mxu0 %v3115_v20  ;;  %2097 = vmatmul.mubr.f32.vlgmr.msra.gmra.mrb[0].mxu1 %v3023_v12 }
  0x61   :  { %2444 = vmatprep.subr.bf16.mxu0 %v3118_v21  ;;  %2469 = vmatpush3.bf16.msra.mxu1 %v3126_v34 }
  0x62   :  { %2470 = vmatprep.subr.bf16.mxu1 %v3022_v11  ;;  %2131 = vmatprep.mubr.msk.f32.mxu1 %vm3024_vm0, %v3023_v12 }
  0x64   :  { %2446 = vmatpush1.bf16.msra.mxu0 %v3121_v26 }
  0x65   :  { %2448 = vmatprep.subr.bf16.mxu0 %v3124_v28  ;;  %2472 = vmatpush3.bf16.msra.mxu1 %v3132_v39 }
  0x66   :  { %2473 = vmatprep.subr.bf16.mxu1 %v3022_v11 }
  0x68   :  { %2450 = vmatpush1.bf16.msra.mxu0 %v3129_v37 }
  0x69   :  { %2452 = vmatprep.subr.bf16.mxu0 %v3135_v40  ;;  %2475 = vmatpush3.bf16.msra.mxu1 %v3142_v48 }
  0x6a   :  { %2476 = vmatprep.subr.bf16.mxu1 %v3022_v11 }
  0x6c   :  { %2454 = vmatpush1.bf16.msra.mxu0 %v3139_v46 }
  0x6d   :  { %2456 = vmatprep.subr.bf16.mxu0 %v3148_v50  ;;  %2478 = vmatpush3.bf16.msra.mxu1 %v3158_v59 }
  0x6e   :  { %2479 = vmatprep.subr.bf16.mxu1 %v3022_v11 }
  0x70   :  { %2458 = vmatpush1.bf16.msra.mxu0 %v3155_v57 }
  0x71   :  { %2460 = vmatprep.subr.bf16.mxu0 %v3161_v60  ;;  %2481 = vmatpush3.bf16.msra.mxu1 %v3171_v5 }
  0x72   :  { %2482 = vmatprep.subr.bf16.mxu1 %v3022_v11 }
  0x74   :  { %2462 = vmatpush1.bf16.msra.mxu0 %v3168_v3 }
  0x75   :  { %2464 = vmatprep.subr.bf16.mxu0 %v3174_v6  ;;  %2484 = vmatpush3.bf16.msra.mxu1 %v3184_v17 }
  0x76   :  { %2485 = vmatprep.subr.bf16.mxu1 %v3022_v11 }
  0x78   :  { %2466 = vmatpush1.bf16.msra.mxu0 %v3181_v16 }
  0x79   :  { %2492 = vmatprep.subr.bf16.mxu0 %v3103_v7  ;;  %2487 = vmatpush3.bf16.msra.mxu1 %v3190_v22 }
  0x7a   :  { %2488 = vmatprep.subr.bf16.mxu1 %v3022_v11 }
  0x7d   :  { %2490 = vmatpush3.bf16.msra.mxu1 %v3196_v25 }
  0x7e   :  { %2523 = vmatprep.subr.bf16.mxu1 %v3022_v11 }
  0xc2   :  { %v293_v36 = vpop.permute.xlu0 %292 }
  0xc3   :  { %v311_v41 = vmul.f32 %v3237_v33, %v293_v36  ;;  %v312_v43 = vmul.f32 %v3239_v38, %v293_v36  ;;  %v313_v4 = vmul.f32 %v3249_v0, %v293_v36  ;;  %v1895_v36 = vld [vmem:[%s3584_s0 + $0x18] sm:$0xff] }
  0xc4   :  { %858 = vperm.xlu1 %2859, %v1895_v36  }
  0xc5   :  { %v330_v45 = vadd.f32 %v3242_v42, %v311_v41  ;;  %v331_v49 = vadd.f32 %v3245_v44, %v312_v43  ;;  %v332_v18 = vadd.f32 %v3254_v8, %v313_v4  ;;  %v1901_v41 = vld [vmem:[%s3584_s0 + $0x28] sm:$0xff]  ;;  %v1907_v43 = vld [vmem:[%s3584_s0 + $0x38] sm:$0xff]  ;;  %s3026_s0 = smov [#allocation9]  }
  0xc6   :  { %s1838_s2 = sshll.u32 %s3026_s0, 4  ;;  %s1839_s2 = int_to_ptr.vmem [resolvable:$true] %s1838_s2 }
  0xc7   :  { %s2984_s19 = scalar_lea.vmem %s1839_s2, 128  ;;  %p2989_p3 = scmp.lt.s32.totalorder %s1839_s2, %s1839_s2 }
  0xc8   :  { %1210 = vperm.xlu1 %2859, %v1901_v41   ;;  %p2985_p2 = scmp.ne.s32.totalorder %s1839_s2, %s2984_s19  ;;  %p2990_p4 = scmp.lt.s32.totalorder %s2984_s19, %s2984_s19 }
  0xca   :  { %p2991_p5 = por %p2990_p4, %p2989_p3 }
  0xcc   :  { %1562 = vperm.xlu1 %2859, %v1907_v43   ;;  %p2992_p6 = pnand %p2991_p5, %p2985_p2 }
 0x12e   :  { %v399_v47 = vpop.f32.mrb[0].mxu0 }
 0x12f   :  { %v474_v51 = vadd.f32 %v399_v47, %v330_v45  ;;  %v401_v52 = vpop.f32.mrb[1].mxu0  ;;  %v507_v45 = vpop.permute.xlu0 %506 }
 0x130   :  { %v481_v54 = vadd.f32 %v401_v52, %v331_v49  ;;  %v509_v47 = vmul.f32 %v507_v45, %v3237_v33  ;;  %v510_v49 = vmul.f32 %v507_v45, %v3239_v38 }
 0x131   :  { %v1886_v53 = vmul.f32 -1.442695, %v474_v51 }
 0x132   :  { %v1887_v55 = vmul.f32 -1.442695, %v481_v54  ;;  %v512_v51 = vadd.f32 %v509_v47, %v3242_v42 }
 0x133   :  { %2860 = vpow2.f32 %v1886_v53  ;;  %v470_v56 = vpop.f32.mrb[0].mxu1 }
 0x134   :  { %v2098_v58 = vpop.f32.mrb[1].mxu1  ;;  %2862 = vpow2.f32 %v1887_v55  ;;  %v494_v10 = vadd.f32 %v3251_v2, %v470_v56 }
 0x135   :  { %v513_v58 = vadd.f32 %v510_v49, %v3245_v44 }
 0x13d   :  { %v2861_v61 = vpop.eup %2860 }
 0x13e   :  { %v478_v62 = vadd.f32 1.0, %v2861_v61  ;;  %v2863_v1 = vpop.eup %2862 }
 0x13f   :  { %v485_v9 = vadd.f32 1.0, %v2863_v1 }
 0x140   :  { %2864 = vrcp.f32 %v478_v62 }
 0x141   :  { %2866 = vrcp.f32 %v485_v9 }
 0x14a   :  { %v2865_v15 = vpop.eup %2864 }
 0x14b   :  { %v495_v19 = vmul.f32 %v2865_v15, %v494_v10  ;;  %v2867_v24 = vpop.eup %2866  ;;  %v511_v10 = vmul.f32 %v507_v45, %v3249_v0 }
 0x14c   :  { %v498_v27 = vsub.f32 1.0, %v2867_v24  ;;  %v500_v31 = vmul.f32 0.0, %v2867_v24 }
 0x14d   :  { %v496_v23 = vadd.f32 %v495_v19, %v332_v18 }
 0x14f   :  { %2868 = vtanh.f32 %v496_v23  ;;  %v514_v23 = vadd.f32 %v511_v10, %v3254_v8 }
 0x159   :  { %v2869_v29 = vpop.eup %2868 }
 0x15a   :  { %v499_v30 = vmul.f32 %v2869_v29, %v498_v27 }
 0x15c   :  { %v3258_v32 = vadd.f32 %v500_v31, %v499_v30 }
 0x15e   :  { %580 = vmatmul.mubr.f32.vlgmr.msra.gmra.mrb[2].mxu0 %v3258_v32  ;;  %2132 = vmatmul.mubr.f32.vlgmr.msra.gmra.mrb[2].mxu1 %v3258_v32 }
 0x15f   :  { %2494 = vmatpush1.bf16.msra.mxu0 %v3107_v13  ;;  %2525 = vmatpush3.bf16.msra.mxu1 %v3126_v34 }
 0x160   :  { %2496 = vmatprep.subr.bf16.mxu0 %v3109_v14  ;;  %2526 = vmatprep.subr.bf16.mxu1 %v3022_v11 }
 0x161   :  { %755 = vmatprep.mubr.f32.mxu0 %v3023_v12  ;;  %2166 = vmatprep.mubr.msk.f32.mxu1 %vm3024_vm0, %v3023_v12 }
 0x163   :  { %2498 = vmatpush1.bf16.msra.mxu0 %v3115_v20  ;;  %2528 = vmatpush3.bf16.msra.mxu1 %v3132_v39 }
 0x164   :  { %2500 = vmatprep.subr.bf16.mxu0 %v3118_v21  ;;  %2529 = vmatprep.subr.bf16.mxu1 %v3022_v11 }
 0x167   :  { %2502 = vmatpush1.bf16.msra.mxu0 %v3121_v26  ;;  %2531 = vmatpush3.bf16.msra.mxu1 %v3142_v48 }
 0x168   :  { %2504 = vmatprep.subr.bf16.mxu0 %v3124_v28  ;;  %2532 = vmatprep.subr.bf16.mxu1 %v3022_v11 }
 0x16b   :  { %2506 = vmatpush1.bf16.msra.mxu0 %v3129_v37  ;;  %2534 = vmatpush3.bf16.msra.mxu1 %v3158_v59 }
 0x16c   :  { %2508 = vmatprep.subr.bf16.mxu0 %v3135_v40  ;;  %2535 = vmatprep.subr.bf16.mxu1 %v3022_v11 }
 0x16f   :  { %2510 = vmatpush1.bf16.msra.mxu0 %v3139_v46  ;;  %2537 = vmatpush3.bf16.msra.mxu1 %v3171_v5 }
 0x170   :  { %2512 = vmatprep.subr.bf16.mxu0 %v3148_v50  ;;  %2538 = vmatprep.subr.bf16.mxu1 %v3022_v11 }
 0x173   :  { %2514 = vmatpush1.bf16.msra.mxu0 %v3155_v57  ;;  %2540 = vmatpush3.bf16.msra.mxu1 %v3184_v17 }
 0x174   :  { %2516 = vmatprep.subr.bf16.mxu0 %v3161_v60  ;;  %2541 = vmatprep.subr.bf16.mxu1 %v3022_v11 }
 0x177   :  { %2518 = vmatpush1.bf16.msra.mxu0 %v3168_v3  ;;  %2543 = vmatpush3.bf16.msra.mxu1 %v3190_v22 }
 0x178   :  { %2520 = vmatprep.subr.bf16.mxu0 %v3174_v6  ;;  %2544 = vmatprep.subr.bf16.mxu1 %v3022_v11 }
 0x17b   :  { %2522 = vmatpush1.bf16.msra.mxu0 %v3181_v16  ;;  %2546 = vmatpush3.bf16.msra.mxu1 %v3196_v25 }
 0x17c   :  { %2548 = vmatprep.subr.bf16.mxu0 %v3103_v7  ;;  %2579 = vmatprep.subr.bf16.mxu1 %v3022_v11 }
 0x231   :  { %v581_v52 = vpop.f32.mrb[2].mxu0  ;;  %v652_v53 = vpop.f32.mrb[2].mxu1 }
 0x232   :  { %v656_v54 = vadd.f32 %v581_v52, %v512_v51  ;;  %v583_v55 = vpop.f32.mrb[3].mxu0  ;;  %v2133_v56 = vpop.f32.mrb[3].mxu1  ;;  %v670_v18 = vadd.f32 %v3251_v2, %v652_v53 }
 0x233   :  { %v663_v62 = vadd.f32 %v583_v55, %v513_v58 }
 0x234   :  { %v1890_v61 = vmul.f32 -1.442695, %v656_v54 }
 0x235   :  { %v1891_v63 = vmul.f32 -1.442695, %v663_v62 }
 0x236   :  { %2870 = vpow2.f32 %v1890_v61 }
 0x237   :  { %2872 = vpow2.f32 %v1891_v63 }
 0x240   :  { %v2871_v1 = vpop.eup %2870 }
 0x241   :  { %v660_v4 = vadd.f32 1.0, %v2871_v1  ;;  %v2873_v9 = vpop.eup %2872 }
 0x242   :  { %v667_v15 = vadd.f32 1.0, %v2873_v9 }
 0x243   :  { %2874 = vrcp.f32 %v660_v4 }
 0x244   :  { %2876 = vrcp.f32 %v667_v15 }
 0x24d   :  { %v2875_v19 = vpop.eup %2874 }
 0x24e   :  { %v671_v24 = vmul.f32 %v2875_v19, %v670_v18  ;;  %v2877_v29 = vpop.eup %2876 }
 0x24f   :  { %v674_v30 = vsub.f32 1.0, %v2877_v29  ;;  %v676_v36 = vmul.f32 %v2877_v29, %v3258_v32  ;;  %v683_v32 = vpop.permute.xlu1 %682 }
 0x250   :  { %v672_v27 = vadd.f32 %v671_v24, %v514_v23  ;;  %v685_v43 = vmul.f32 %v683_v32, %v3237_v33  ;;  %v686_v45 = vmul.f32 %v683_v32, %v3239_v38  ;;  %v687_v4 = vmul.f32 %v683_v32, %v3249_v0 }
 0x252   :  { %2878 = vtanh.f32 %v672_v27  ;;  %v688_v47 = vadd.f32 %v685_v43, %v3242_v42  ;;  %v689_v52 = vadd.f32 %v686_v45, %v3245_v44  ;;  %v690_v18 = vadd.f32 %v687_v4, %v3254_v8 }
 0x25c   :  { %v2879_v31 = vpop.eup %2878 }
 0x25d   :  { %v675_v35 = vmul.f32 %v2879_v31, %v674_v30 }
 0x25f   :  { %v3317_v41 = vadd.f32 %v676_v36, %v675_v35  ;;  %v859_v36 = vpop.permute.xlu1 %858 }
 0x260   :  { %v862_v32 = vmul.f32 %v859_v36, %v3239_v38 }
 0x261   :  { %756 = vmatmul.mubr.f32.vlgmr.msra.gmra.mrb[4].mxu0 %v3317_v41  ;;  %2167 = vmatmul.mubr.f32.vlgmr.msra.gmra.mrb[4].mxu1 %v3317_v41 }
 0x262   :  { %2550 = vmatpush1.bf16.msra.mxu0 %v3107_v13  ;;  %2581 = vmatpush3.bf16.msra.mxu1 %v3126_v34 }
 0x263   :  { %2552 = vmatprep.subr.bf16.mxu0 %v3109_v14  ;;  %2582 = vmatprep.subr.bf16.mxu1 %v3022_v11 }
 0x264   :  { %931 = vmatprep.mubr.f32.mxu0 %v3023_v12  ;;  %2201 = vmatprep.mubr.msk.f32.mxu1 %vm3024_vm0, %v3023_v12 }
 0x266   :  { %2554 = vmatpush1.bf16.msra.mxu0 %v3115_v20  ;;  %2584 = vmatpush3.bf16.msra.mxu1 %v3132_v39 }
 0x267   :  { %2556 = vmatprep.subr.bf16.mxu0 %v3118_v21  ;;  %2585 = vmatprep.subr.bf16.mxu1 %v3022_v11 }
 0x26a   :  { %2558 = vmatpush1.bf16.msra.mxu0 %v3121_v26  ;;  %2587 = vmatpush3.bf16.msra.mxu1 %v3142_v48 }
 0x26b   :  { %2560 = vmatprep.subr.bf16.mxu0 %v3124_v28  ;;  %2588 = vmatprep.subr.bf16.mxu1 %v3022_v11 }
 0x26e   :  { %2562 = vmatpush1.bf16.msra.mxu0 %v3129_v37  ;;  %2590 = vmatpush3.bf16.msra.mxu1 %v3158_v59 }
 0x26f   :  { %2564 = vmatprep.subr.bf16.mxu0 %v3135_v40  ;;  %2591 = vmatprep.subr.bf16.mxu1 %v3022_v11 }
 0x272   :  { %2566 = vmatpush1.bf16.msra.mxu0 %v3139_v46  ;;  %2593 = vmatpush3.bf16.msra.mxu1 %v3171_v5 }
 0x273   :  { %2568 = vmatprep.subr.bf16.mxu0 %v3148_v50  ;;  %2594 = vmatprep.subr.bf16.mxu1 %v3022_v11 }
 0x276   :  { %2570 = vmatpush1.bf16.msra.mxu0 %v3155_v57  ;;  %2596 = vmatpush3.bf16.msra.mxu1 %v3184_v17 }
 0x277   :  { %2572 = vmatprep.subr.bf16.mxu0 %v3161_v60  ;;  %2597 = vmatprep.subr.bf16.mxu1 %v3022_v11 }
 0x27a   :  { %2574 = vmatpush1.bf16.msra.mxu0 %v3168_v3  ;;  %2599 = vmatpush3.bf16.msra.mxu1 %v3190_v22 }
 0x27b   :  { %2576 = vmatprep.subr.bf16.mxu0 %v3174_v6  ;;  %2600 = vmatprep.subr.bf16.mxu1 %v3022_v11 }
 0x27e   :  { %2578 = vmatpush1.bf16.msra.mxu0 %v3181_v16  ;;  %2602 = vmatpush3.bf16.msra.mxu1 %v3196_v25 }
 0x27f   :  { %2604 = vmatprep.subr.bf16.mxu0 %v3103_v7  ;;  %2635 = vmatprep.subr.bf16.mxu1 %v3022_v11 }
 0x334   :  { %v757_v49 = vpop.f32.mrb[4].mxu0  ;;  %v828_v51 = vpop.f32.mrb[4].mxu1 }
 0x335   :  { %v832_v53 = vadd.f32 %v757_v49, %v688_v47  ;;  %v759_v54 = vpop.f32.mrb[5].mxu0  ;;  %v2168_v55 = vpop.f32.mrb[5].mxu1  ;;  %v846_v10 = vadd.f32 %v3251_v2, %v828_v51 }
 0x336   :  { %v839_v58 = vadd.f32 %v759_v54, %v689_v52 }
 0x337   :  { %v1893_v56 = vmul.f32 -1.442695, %v832_v53  ;;  %v865_v53 = vadd.f32 %v862_v32, %v3245_v44 }
 0x338   :  { %v1894_v61 = vmul.f32 -1.442695, %v839_v58 }
 0x339   :  { %2880 = vpow2.f32 %v1893_v56 }
 0x33a   :  { %2882 = vpow2.f32 %v1894_v61 }
 0x343   :  { %v2881_v62 = vpop.eup %2880 }
 0x344   :  { %v836_v63 = vadd.f32 1.0, %v2881_v62  ;;  %v2883_v1 = vpop.eup %2882 }
 0x345   :  { %v843_v9 = vadd.f32 1.0, %v2883_v1 }
 0x346   :  { %2884 = vrcp.f32 %v836_v63  ;;  %v863_v63 = vmul.f32 %v859_v36, %v3249_v0 }
 0x347   :  { %2886 = vrcp.f32 %v843_v9 }
 0x350   :  { %v2885_v15 = vpop.eup %2884 }
 0x351   :  { %v847_v19 = vmul.f32 %v2885_v15, %v846_v10  ;;  %v2887_v24 = vpop.eup %2886  ;;  %v866_v10 = vadd.f32 %v863_v63, %v3254_v8 }
 0x352   :  { %v850_v27 = vsub.f32 1.0, %v2887_v24  ;;  %v852_v31 = vmul.f32 %v2887_v24, %v3317_v41  ;;  %v861_v41 = vmul.f32 %v859_v36, %v3237_v33 }
 0x353   :  { %v848_v23 = vadd.f32 %v847_v19, %v690_v18 }
 0x354   :  { %v864_v43 = vadd.f32 %v861_v41, %v3242_v42 }
 0x355   :  { %2888 = vtanh.f32 %v848_v23 }
 0x35f   :  { %v2889_v29 = vpop.eup %2888 }
 0x360   :  { %v851_v30 = vmul.f32 %v2889_v29, %v850_v27 }
 0x362   :  { %v3364_v35 = vadd.f32 %v852_v31, %v851_v30  ;;  %v1035_v31 = vpop.permute.xlu0 %1034 }
 0x363   :  { %v1038_v36 = vmul.f32 %v1035_v31, %v3239_v38 }
 0x364   :  { %932 = vmatmul.mubr.f32.vlgmr.msra.gmra.mrb[6].mxu0 %v3364_v35  ;;  %2202 = vmatmul.mubr.f32.vlgmr.msra.gmra.mrb[6].mxu1 %v3364_v35 }
 0x365   :  { %2606 = vmatpush1.bf16.msra.mxu0 %v3107_v13  ;;  %2637 = vmatpush3.bf16.msra.mxu1 %v3126_v34 }
 0x366   :  { %2608 = vmatprep.subr.bf16.mxu0 %v3109_v14  ;;  %2638 = vmatprep.subr.bf16.mxu1 %v3022_v11 }
 0x367   :  { %1107 = vmatprep.mubr.f32.mxu0 %v3023_v12  ;;  %2236 = vmatprep.mubr.msk.f32.mxu1 %vm3024_vm0, %v3023_v12 }
 0x369   :  { %2610 = vmatpush1.bf16.msra.mxu0 %v3115_v20  ;;  %2640 = vmatpush3.bf16.msra.mxu1 %v3132_v39 }
 0x36a   :  { %2612 = vmatprep.subr.bf16.mxu0 %v3118_v21  ;;  %2641 = vmatprep.subr.bf16.mxu1 %v3022_v11 }
 0x36d   :  { %2614 = vmatpush1.bf16.msra.mxu0 %v3121_v26  ;;  %2643 = vmatpush3.bf16.msra.mxu1 %v3142_v48 }
 0x36e   :  { %2616 = vmatprep.subr.bf16.mxu0 %v3124_v28  ;;  %2644 = vmatprep.subr.bf16.mxu1 %v3022_v11 }
 0x371   :  { %2618 = vmatpush1.bf16.msra.mxu0 %v3129_v37  ;;  %2646 = vmatpush3.bf16.msra.mxu1 %v3158_v59 }
 0x372   :  { %2620 = vmatprep.subr.bf16.mxu0 %v3135_v40  ;;  %2647 = vmatprep.subr.bf16.mxu1 %v3022_v11 }
 0x375   :  { %2622 = vmatpush1.bf16.msra.mxu0 %v3139_v46  ;;  %2649 = vmatpush3.bf16.msra.mxu1 %v3171_v5 }
 0x376   :  { %2624 = vmatprep.subr.bf16.mxu0 %v3148_v50  ;;  %2650 = vmatprep.subr.bf16.mxu1 %v3022_v11 }
 0x379   :  { %2626 = vmatpush1.bf16.msra.mxu0 %v3155_v57  ;;  %2652 = vmatpush3.bf16.msra.mxu1 %v3184_v17 }
 0x37a   :  { %2628 = vmatprep.subr.bf16.mxu0 %v3161_v60  ;;  %2653 = vmatprep.subr.bf16.mxu1 %v3022_v11 }
 0x37d   :  { %2630 = vmatpush1.bf16.msra.mxu0 %v3168_v3  ;;  %2655 = vmatpush3.bf16.msra.mxu1 %v3190_v22 }
 0x37e   :  { %2632 = vmatprep.subr.bf16.mxu0 %v3174_v6  ;;  %2656 = vmatprep.subr.bf16.mxu1 %v3022_v11 }
 0x381   :  { %2634 = vmatpush1.bf16.msra.mxu0 %v3181_v16  ;;  %2658 = vmatpush3.bf16.msra.mxu1 %v3196_v25 }
 0x382   :  { %2660 = vmatprep.subr.bf16.mxu0 %v3103_v7  ;;  %2691 = vmatprep.subr.bf16.mxu1 %v3022_v11 }
 0x437   :  { %v933_v45 = vpop.f32.mrb[6].mxu0  ;;  %v1004_v47 = vpop.f32.mrb[6].mxu1 }
 0x438   :  { %v1008_v49 = vadd.f32 %v933_v45, %v864_v43  ;;  %v935_v51 = vpop.f32.mrb[7].mxu0  ;;  %v2203_v52 = vpop.f32.mrb[7].mxu1  ;;  %v1022_v4 = vadd.f32 %v3251_v2, %v1004_v47 }
 0x439   :  { %v1015_v55 = vadd.f32 %v935_v51, %v865_v53  ;;  %v1041_v51 = vadd.f32 %v1038_v36, %v3245_v44 }
 0x43a   :  { %v1896_v54 = vmul.f32 -1.442695, %v1008_v49 }
 0x43b   :  { %v1897_v56 = vmul.f32 -1.442695, %v1015_v55 }
 0x43c   :  { %2890 = vpow2.f32 %v1896_v54 }
 0x43d   :  { %2892 = vpow2.f32 %v1897_v56 }
 0x446   :  { %v2891_v58 = vpop.eup %2890 }
 0x447   :  { %v1012_v61 = vadd.f32 1.0, %v2891_v58  ;;  %v2893_v62 = vpop.eup %2892 }
 0x448   :  { %v1019_v1 = vadd.f32 1.0, %v2893_v62 }
 0x449   :  { %2894 = vrcp.f32 %v1012_v61  ;;  %v1039_v61 = vmul.f32 %v1035_v31, %v3249_v0 }
 0x44a   :  { %2896 = vrcp.f32 %v1019_v1 }
 0x453   :  { %v2895_v9 = vpop.eup %2894 }
 0x454   :  { %v1023_v15 = vmul.f32 %v2895_v9, %v1022_v4  ;;  %v2897_v19 = vpop.eup %2896  ;;  %v1042_v4 = vadd.f32 %v1039_v61, %v3254_v8 }
 0x455   :  { %v1026_v23 = vsub.f32 1.0, %v2897_v19  ;;  %v1028_v29 = vmul.f32 %v2897_v19, %v3364_v35  ;;  %v1037_v35 = vmul.f32 %v1035_v31, %v3237_v33 }
 0x456   :  { %v1024_v18 = vadd.f32 %v1023_v15, %v866_v10 }
 0x457   :  { %v1040_v41 = vadd.f32 %v1037_v35, %v3242_v42 }
 0x458   :  { %2898 = vtanh.f32 %v1024_v18 }
 0x462   :  { %v2899_v24 = vpop.eup %2898 }
 0x463   :  { %v1027_v27 = vmul.f32 %v2899_v24, %v1026_v23 }
 0x465   :  { %v3411_v30 = vadd.f32 %v1028_v29, %v1027_v27  ;;  %v1211_v29 = vpop.permute.xlu1 %1210 }
 0x466   :  { %v1214_v31 = vmul.f32 %v1211_v29, %v3239_v38 }
 0x467   :  { %1108 = vmatmul.mubr.f32.vlgmr.msra.gmra.mrb[8].mxu0 %v3411_v30  ;;  %2237 = vmatmul.mubr.f32.vlgmr.msra.gmra.mrb[8].mxu1 %v3411_v30 }
 0x468   :  { %2662 = vmatpush1.bf16.msra.mxu0 %v3107_v13  ;;  %2693 = vmatpush3.bf16.msra.mxu1 %v3126_v34 }
 0x469   :  { %2664 = vmatprep.subr.bf16.mxu0 %v3109_v14  ;;  %2694 = vmatprep.subr.bf16.mxu1 %v3022_v11 }
 0x46a   :  { %1283 = vmatprep.mubr.f32.mxu0 %v3023_v12  ;;  %2271 = vmatprep.mubr.msk.f32.mxu1 %vm3024_vm0, %v3023_v12 }
 0x46c   :  { %2666 = vmatpush1.bf16.msra.mxu0 %v3115_v20  ;;  %2696 = vmatpush3.bf16.msra.mxu1 %v3132_v39 }
 0x46d   :  { %2668 = vmatprep.subr.bf16.mxu0 %v3118_v21  ;;  %2697 = vmatprep.subr.bf16.mxu1 %v3022_v11 }
 0x470   :  { %2670 = vmatpush1.bf16.msra.mxu0 %v3121_v26  ;;  %2699 = vmatpush3.bf16.msra.mxu1 %v3142_v48 }
 0x471   :  { %2672 = vmatprep.subr.bf16.mxu0 %v3124_v28  ;;  %2700 = vmatprep.subr.bf16.mxu1 %v3022_v11 }
 0x474   :  { %2674 = vmatpush1.bf16.msra.mxu0 %v3129_v37  ;;  %2702 = vmatpush3.bf16.msra.mxu1 %v3158_v59 }
 0x475   :  { %2676 = vmatprep.subr.bf16.mxu0 %v3135_v40  ;;  %2703 = vmatprep.subr.bf16.mxu1 %v3022_v11 }
 0x478   :  { %2678 = vmatpush1.bf16.msra.mxu0 %v3139_v46  ;;  %2705 = vmatpush3.bf16.msra.mxu1 %v3171_v5 }
 0x479   :  { %2680 = vmatprep.subr.bf16.mxu0 %v3148_v50  ;;  %2706 = vmatprep.subr.bf16.mxu1 %v3022_v11 }
 0x47c   :  { %2682 = vmatpush1.bf16.msra.mxu0 %v3155_v57  ;;  %2708 = vmatpush3.bf16.msra.mxu1 %v3184_v17 }
 0x47d   :  { %2684 = vmatprep.subr.bf16.mxu0 %v3161_v60  ;;  %2709 = vmatprep.subr.bf16.mxu1 %v3022_v11 }
 0x480   :  { %2686 = vmatpush1.bf16.msra.mxu0 %v3168_v3  ;;  %2711 = vmatpush3.bf16.msra.mxu1 %v3190_v22 }
 0x481   :  { %2688 = vmatprep.subr.bf16.mxu0 %v3174_v6  ;;  %2712 = vmatprep.subr.bf16.mxu1 %v3022_v11 }
 0x484   :  { %2690 = vmatpush1.bf16.msra.mxu0 %v3181_v16  ;;  %2714 = vmatpush3.bf16.msra.mxu1 %v3196_v25 }
 0x485   :  { %2716 = vmatprep.subr.bf16.mxu0 %v3103_v7  ;;  %2747 = vmatprep.subr.bf16.mxu1 %v3022_v11 }
 0x53a   :  { %v1109_v32 = vpop.f32.mrb[8].mxu0  ;;  %v1180_v43 = vpop.f32.mrb[8].mxu1 }
 0x53b   :  { %v1184_v45 = vadd.f32 %v1109_v32, %v1040_v41  ;;  %v1111_v47 = vpop.f32.mrb[9].mxu0  ;;  %v2238_v49 = vpop.f32.mrb[9].mxu1  ;;  %v1198_v63 = vadd.f32 %v3251_v2, %v1180_v43 }
 0x53c   :  { %v1191_v53 = vadd.f32 %v1111_v47, %v1041_v51  ;;  %v1217_v47 = vadd.f32 %v1214_v31, %v3245_v44 }
 0x53d   :  { %v1899_v52 = vmul.f32 -1.442695, %v1184_v45 }
 0x53e   :  { %v1900_v54 = vmul.f32 -1.442695, %v1191_v53 }
 0x53f   :  { %2900 = vpow2.f32 %v1899_v52 }
 0x540   :  { %2902 = vpow2.f32 %v1900_v54 }
 0x549   :  { %v2901_v55 = vpop.eup %2900 }
 0x54a   :  { %v1188_v56 = vadd.f32 1.0, %v2901_v55  ;;  %v2903_v58 = vpop.eup %2902  ;;  %v1215_v55 = vmul.f32 %v1211_v29, %v3249_v0 }
 0x54b   :  { %v1195_v62 = vadd.f32 1.0, %v2903_v58 }
 0x54c   :  { %2904 = vrcp.f32 %v1188_v56 }
 0x54d   :  { %2906 = vrcp.f32 %v1195_v62  ;;  %v1218_v62 = vadd.f32 %v1215_v55, %v3254_v8 }
 0x556   :  { %v2905_v1 = vpop.eup %2904 }
 0x557   :  { %v1199_v9 = vmul.f32 %v2905_v1, %v1198_v63  ;;  %v2907_v15 = vpop.eup %2906 }
 0x558   :  { %v1202_v18 = vsub.f32 1.0, %v2907_v15  ;;  %v1204_v24 = vmul.f32 %v2907_v15, %v3411_v30  ;;  %v1213_v30 = vmul.f32 %v1211_v29, %v3237_v33 }
 0x559   :  { %v1200_v10 = vadd.f32 %v1199_v9, %v1042_v4 }
 0x55a   :  { %v1216_v35 = vadd.f32 %v1213_v30, %v3242_v42 }
 0x55b   :  { %2908 = vtanh.f32 %v1200_v10 }
 0x565   :  { %v2909_v19 = vpop.eup %2908 }
 0x566   :  { %v1203_v23 = vmul.f32 %v2909_v19, %v1202_v18 }
 0x568   :  { %v3458_v27 = vadd.f32 %v1204_v24, %v1203_v23 }
 0x56a   :  { %1284 = vmatmul.mubr.f32.vlgmr.msra.gmra.mrb[10].mxu0 %v3458_v27  ;;  %2272 = vmatmul.mubr.f32.vlgmr.msra.gmra.mrb[10].mxu1 %v3458_v27 }
 0x56b   :  { %2718 = vmatpush1.bf16.msra.mxu0 %v3107_v13  ;;  %2749 = vmatpush3.bf16.msra.mxu1 %v3126_v34 }
 0x56c   :  { %2720 = vmatprep.subr.bf16.mxu0 %v3109_v14  ;;  %2750 = vmatprep.subr.bf16.mxu1 %v3022_v11 }
 0x56d   :  { %1459 = vmatprep.mubr.f32.mxu0 %v3023_v12  ;;  %2306 = vmatprep.mubr.msk.f32.mxu1 %vm3024_vm0, %v3023_v12 }
 0x56f   :  { %2722 = vmatpush1.bf16.msra.mxu0 %v3115_v20  ;;  %2752 = vmatpush3.bf16.msra.mxu1 %v3132_v39 }
 0x570   :  { %2724 = vmatprep.subr.bf16.mxu0 %v3118_v21  ;;  %2753 = vmatprep.subr.bf16.mxu1 %v3022_v11 }
 0x573   :  { %2726 = vmatpush1.bf16.msra.mxu0 %v3121_v26  ;;  %2755 = vmatpush3.bf16.msra.mxu1 %v3142_v48 }
 0x574   :  { %2728 = vmatprep.subr.bf16.mxu0 %v3124_v28  ;;  %2756 = vmatprep.subr.bf16.mxu1 %v3022_v11 }
 0x577   :  { %2730 = vmatpush1.bf16.msra.mxu0 %v3129_v37  ;;  %2758 = vmatpush3.bf16.msra.mxu1 %v3158_v59 }
 0x578   :  { %2732 = vmatprep.subr.bf16.mxu0 %v3135_v40  ;;  %2759 = vmatprep.subr.bf16.mxu1 %v3022_v11 }
 0x57b   :  { %2734 = vmatpush1.bf16.msra.mxu0 %v3139_v46  ;;  %2761 = vmatpush3.bf16.msra.mxu1 %v3171_v5 }
 0x57c   :  { %2736 = vmatprep.subr.bf16.mxu0 %v3148_v50  ;;  %2762 = vmatprep.subr.bf16.mxu1 %v3022_v11 }
 0x57f   :  { %2738 = vmatpush1.bf16.msra.mxu0 %v3155_v57  ;;  %2764 = vmatpush3.bf16.msra.mxu1 %v3184_v17 }
 0x580   :  { %2740 = vmatprep.subr.bf16.mxu0 %v3161_v60  ;;  %2765 = vmatprep.subr.bf16.mxu1 %v3022_v11 }
 0x583   :  { %2742 = vmatpush1.bf16.msra.mxu0 %v3168_v3  ;;  %2767 = vmatpush3.bf16.msra.mxu1 %v3190_v22 }
 0x584   :  { %2744 = vmatprep.subr.bf16.mxu0 %v3174_v6  ;;  %2768 = vmatprep.subr.bf16.mxu1 %v3022_v11 }
 0x587   :  { %2746 = vmatpush1.bf16.msra.mxu0 %v3181_v16  ;;  %2770 = vmatpush3.bf16.msra.mxu1 %v3196_v25 }
 0x588   :  { %2772 = vmatprep.subr.bf16.mxu0 %v3103_v7  ;;  %2803 = vmatprep.subr.bf16.mxu1 %v3022_v11 }
 0x63d   :  { %v1285_v36 = vpop.f32.mrb[10].mxu0  ;;  %v1356_v41 = vpop.f32.mrb[10].mxu1 }
 0x63e   :  { %v1360_v32 = vadd.f32 %v1285_v36, %v1216_v35  ;;  %v1287_v43 = vpop.f32.mrb[11].mxu0  ;;  %v2273_v45 = vpop.f32.mrb[11].mxu1  ;;  %v1374_v58 = vadd.f32 %v3251_v2, %v1356_v41  ;;  %v1738_v35 = vld [vmem:[#allocation6] sm:$0xff]  ;;  %v1739_v36 = vld [vmem:[#allocation6 + $0x8] sm:$0xff] }
 0x63f   :  { %v1367_v51 = vadd.f32 %v1287_v43, %v1217_v47  ;;  %v2828_v41 = vpack.c.bf16 %v1739_v36, %v1738_v35  ;;  %v1741_v43 = vld [vmem:[#allocation6 + $0x18] sm:$0xff]  ;;  %v1742_v47 = vld [vmem:[#allocation6 + $0x20] sm:$0xff] }
 0x640   :  { %v1902_v49 = vmul.f32 -1.442695, %v1360_v32  ;;  %v1740_v32 = vld [vmem:[#allocation6 + $0x10] sm:$0xff] }
 0x641   :  { %v1903_v7 = vmul.f32 -1.442695, %v1367_v51  ;;  %v2831_v45 = vpack.c.bf16 %v1741_v43, %v1740_v32 }
 0x642   :  { %2910 = vpow2.f32 %v1902_v49  ;;  %v1743_v49 = vld [vmem:[#allocation6 + $0x28] sm:$0xff] }
 0x643   :  { %2912 = vpow2.f32 %v1903_v7  ;;  %v2834_v51 = vpack.c.bf16 %v1743_v49, %v1742_v47  ;;  %v1744_v7 = vld [vmem:[#allocation6 + $0x30] sm:$0xff] }
 0x64c   :  { %v2911_v52 = vpop.eup %2910 }
 0x64d   :  { %v1364_v53 = vadd.f32 1.0, %v2911_v52  ;;  %v2913_v54 = vpop.eup %2912 }
 0x64e   :  { %v1371_v56 = vadd.f32 1.0, %v2913_v54  ;;  %v1747_v54 = vld [vmem:[#allocation6 + $0x48] sm:$0xff] }
 0x64f   :  { %2914 = vrcp.f32 %v1364_v53  ;;  %v1746_v53 = vld [vmem:[#allocation6 + $0x40] sm:$0xff] }
 0x650   :  { %2916 = vrcp.f32 %v1371_v56  ;;  %v2840_v55 = vpack.c.bf16 %v1747_v54, %v1746_v53  ;;  %v1748_v56 = vld [vmem:[#allocation6 + $0x50] sm:$0xff] }
 0x659   :  { %v2915_v61 = vpop.eup %2914 }
 0x65a   :  { %v1375_v63 = vmul.f32 %v2915_v61, %v1374_v58  ;;  %v2917_v4 = vpop.eup %2916  ;;  %v1749_v58 = vld [vmem:[#allocation6 + $0x58] sm:$0xff] }
 0x65b   :  { %v1378_v9 = vsub.f32 1.0, %v2917_v4  ;;  %v1380_v18 = vmul.f32 %v2917_v4, %v3458_v27  ;;  %v2843_v61 = vpack.c.bf16 %v1749_v58, %v1748_v56  ;;  %v1752_v4 = vld [vmem:[#allocation6 + $0x70] sm:$0xff] }
 0x65c   :  { %v1376_v1 = vadd.f32 %v1375_v63, %v1218_v62  ;;  %v1750_v62 = vld [vmem:[#allocation6 + $0x60] sm:$0xff]  ;;  %v1751_v63 = vld [vmem:[#allocation6 + $0x68] sm:$0xff] }
 0x65e   :  { %2918 = vtanh.f32 %v1376_v1  ;;  %v2846_v1 = vpack.c.bf16 %v1751_v63, %v1750_v62 }
 0x668   :  { %v2919_v10 = vpop.eup %2918 }
 0x669   :  { %v1379_v15 = vmul.f32 %v2919_v10, %v1378_v9  ;;  %v1753_v9 = vld [vmem:[#allocation6 + $0x78] sm:$0xff] }
 0x66a   :  { %v2849_v10 = vpack.c.bf16 %v1753_v9, %v1752_v4 }
 0x66b   :  { %v3505_v19 = vadd.f32 %v1380_v18, %v1379_v15  ;;  %v1563_v15 = vpop.permute.xlu1 %1562 }
 0x66c   :  { %v1565_v18 = vmul.f32 %v1563_v15, %v3237_v33 }
 0x66d   :  { %1460 = vmatmul.mubr.f32.vlgmr.msra.gmra.mrb[12].mxu0 %v3505_v19  ;;  %2307 = vmatmul.mubr.f32.vlgmr.msra.gmra.mrb[12].mxu1 %v3505_v19 }
 0x66e   :  { %2774 = vmatpush1.bf16.msra.mxu0 %v3107_v13  ;;  %2805 = vmatpush3.bf16.msra.mxu1 %v3126_v34  ;;  %v1387_v13 = vpop.permute.xlu0 %1386 }
 0x66f   :  { %2776 = vmatprep.subr.bf16.mxu0 %v3109_v14  ;;  %2806 = vmatprep.subr.bf16.mxu1 %v3022_v11  ;;  %v1389_v14 = vmul.f32 %v1387_v13, %v3237_v33 }
 0x670   :  { %1635 = vmatprep.mubr.f32.mxu0 %v3023_v12  ;;  %2341 = vmatprep.mubr.msk.f32.mxu1 %vm3024_vm0, %v3023_v12 }
 0x672   :  { %2778 = vmatpush1.bf16.msra.mxu0 %v3115_v20  ;;  %2808 = vmatpush3.bf16.msra.mxu1 %v3132_v39  ;;  %v1390_v20 = vmul.f32 %v1387_v13, %v3239_v38 }
 0x673   :  { %2780 = vmatprep.subr.bf16.mxu0 %v3118_v21  ;;  %2809 = vmatprep.subr.bf16.mxu1 %v3022_v11  ;;  %v1392_v21 = vadd.f32 %v1389_v14, %v3242_v42 }
 0x676   :  { %2782 = vmatpush1.bf16.msra.mxu0 %v3121_v26  ;;  %2811 = vmatpush3.bf16.msra.mxu1 %v3142_v48 }
 0x677   :  { %2784 = vmatprep.subr.bf16.mxu0 %v3124_v28  ;;  %2812 = vmatprep.subr.bf16.mxu1 %v3022_v11 }
 0x67a   :  { %2786 = vmatpush1.bf16.msra.mxu0 %v3129_v37  ;;  %2814 = vmatpush3.bf16.msra.mxu1 %v3158_v59 }
 0x67b   :  { %2788 = vmatprep.subr.bf16.mxu0 %v3135_v40  ;;  %2815 = vmatprep.subr.bf16.mxu1 %v3022_v11  ;;  %v1393_v40 = vadd.f32 %v1390_v20, %v3245_v44 }
 0x67e   :  { %2790 = vmatpush1.bf16.msra.mxu0 %v3139_v46  ;;  %2817 = vmatpush3.bf16.msra.mxu1 %v3171_v5 }
 0x67f   :  { %2792 = vmatprep.subr.bf16.mxu0 %v3148_v50  ;;  %2818 = vmatprep.subr.bf16.mxu1 %v3022_v11 }
 0x682   :  { %2794 = vmatpush1.bf16.msra.mxu0 %v3155_v57  ;;  %2820 = vmatpush3.bf16.msra.mxu1 %v3184_v17 }
 0x683   :  { %2796 = vmatprep.subr.bf16.mxu0 %v3161_v60  ;;  %2821 = vmatprep.subr.bf16.mxu1 %v3022_v11 }
 0x686   :  { %2798 = vmatpush1.bf16.msra.mxu0 %v3168_v3  ;;  %2823 = vmatpush3.bf16.msra.mxu1 %v3190_v22  ;;  %v1391_v3 = vmul.f32 %v1387_v13, %v3249_v0  ;;  %v1568_v13 = vadd.f32 %v1565_v18, %v3242_v42 }
 0x687   :  { %2800 = vmatprep.subr.bf16.mxu0 %v3174_v6  ;;  %2824 = vmatprep.subr.bf16.mxu1 %v3022_v11 }
 0x688   :  { %v1394_v17 = vadd.f32 %v1391_v3, %v3254_v8 }
 0x68a   :  { %2802 = vmatpush1.bf16.msra.mxu0 %v3181_v16  ;;  %2826 = vmatpush3.bf16.msra.mxu1 %v3196_v25 }
 0x68b   :  { %2827 = vmatprep.subr.bf16.mxu0 %v3022_v11 }
 0x740   :  { %v1461_v26 = vpop.f32.mrb[12].mxu0  ;;  %v1532_v28 = vpop.f32.mrb[12].mxu1 }
 0x741   :  { %v1536_v34 = vadd.f32 %v1461_v26, %v1392_v21  ;;  %v1463_v37 = vpop.f32.mrb[13].mxu0  ;;  %v2308_v39 = vpop.f32.mrb[13].mxu1  ;;  %v1550_v6 = vadd.f32 %v3251_v2, %v1532_v28 }
 0x742   :  { %v1543_v48 = vadd.f32 %v1463_v37, %v1393_v40 }
 0x743   :  { %v1905_v46 = vmul.f32 -1.442695, %v1536_v34 }
 0x744   :  { %v1906_v50 = vmul.f32 -1.442695, %v1543_v48 }
 0x745   :  { %2920 = vpow2.f32 %v1905_v46 }
 0x746   :  { %2922 = vpow2.f32 %v1906_v50 }
 0x74f   :  { %v2921_v57 = vpop.eup %2920 }
 0x750   :  { %v1540_v59 = vadd.f32 1.0, %v2921_v57  ;;  %v2923_v60 = vpop.eup %2922 }
 0x751   :  { %v1547_v5 = vadd.f32 1.0, %v2923_v60 }
 0x752   :  { %2924 = vrcp.f32 %v1540_v59 }
 0x753   :  { %2926 = vrcp.f32 %v1547_v5 }
 0x75c   :  { %v2925_v16 = vpop.eup %2924 }
 0x75d   :  { %v1551_v22 = vmul.f32 %v2925_v16, %v1550_v6  ;;  %v2927_v23 = vpop.eup %2926 }
 0x75e   :  { %v1554_v24 = vsub.f32 1.0, %v2927_v23  ;;  %v1556_v30 = vmul.f32 %v2927_v23, %v3505_v19  ;;  %v1566_v19 = vmul.f32 %v1563_v15, %v3239_v38  ;;  %v1567_v38 = vmul.f32 %v1563_v15, %v3249_v0 }
 0x75f   :  { %v1552_v25 = vadd.f32 %v1551_v22, %v1394_v17  ;;  %v1910_v22 = vld [vmem:[#allocation7] ss:$0 sm:$0xff] }
 0x760   :  { %v1569_v34 = vadd.f32 %v1566_v19, %v3245_v44  ;;  %v1570_v57 = vadd.f32 %v1567_v38, %v3254_v8 }
 0x761   :  { %2928 = vtanh.f32 %v1552_v25 }
 0x76b   :  { %v2929_v27 = vpop.eup %2928 }
 0x76c   :  { %v1555_v29 = vmul.f32 %v2929_v27, %v1554_v24 }
 0x76e   :  { %v3551_v31 = vadd.f32 %v1556_v30, %v1555_v29 }
 0x770   :  { %1636 = vmatmul.mubr.f32.vlgmr.msra.gmra.mrb[14].mxu0 %v3551_v31  ;;  %2342 = vmatmul.mubr.f32.vlgmr.msra.gmra.mrb[14].mxu1 %v3551_v31 }
 0x771   :  { %2376 = vmatprep.mubr.msk.f32.mxu0 %vm3024_vm0, %v3023_v12  ;;  %2829 = vmatpush3.bf16.msra.mxu0 %v2828_v41  ;;  %v1745_v12 = vld [vmem:[#allocation6 + $0x38] sm:$0xff] }
 0x772   :  { %2830 = vmatprep.subr.bf16.mxu0 %v3022_v11  ;;  %v2837_v52 = vpack.c.bf16 %v1745_v12, %v1744_v7 }
 0x775   :  { %2832 = vmatpush3.bf16.msra.mxu0 %v2831_v45 }
 0x776   :  { %2833 = vmatprep.subr.bf16.mxu0 %v3022_v11 }
 0x779   :  { %2835 = vmatpush3.bf16.msra.mxu0 %v2834_v51 }
 0x77a   :  { %2836 = vmatprep.subr.bf16.mxu0 %v3022_v11 }
 0x77d   :  { %2838 = vmatpush3.bf16.msra.mxu0 %v2837_v52 }
 0x77e   :  { %2839 = vmatprep.subr.bf16.mxu0 %v3022_v11 }
 0x781   :  { %2841 = vmatpush3.bf16.msra.mxu0 %v2840_v55 }
 0x782   :  { %2842 = vmatprep.subr.bf16.mxu0 %v3022_v11 }
 0x785   :  { %2844 = vmatpush3.bf16.msra.mxu0 %v2843_v61 }
 0x786   :  { %2845 = vmatprep.subr.bf16.mxu0 %v3022_v11 }
 0x789   :  { %2847 = vmatpush3.bf16.msra.mxu0 %v2846_v1 }
 0x78a   :  { %2848 = vmatprep.subr.bf16.mxu0 %v3022_v11 }
 0x78d   :  { %2850 = vmatpush3.bf16.msra.mxu0 %v2849_v10 }
 0x843   :  { %v1637_v14 = vpop.f32.mrb[14].mxu0  ;;  %v1708_v20 = vpop.f32.mrb[14].mxu1 }
 0x844   :  { %v1712_v21 = vadd.f32 %v1637_v14, %v1568_v13  ;;  %v1639_v26 = vpop.f32.mrb[15].mxu0  ;;  %v2343_v28 = vpop.f32.mrb[15].mxu1  ;;  %v1726_v42 = vadd.f32 %v3251_v2, %v1708_v20 }
 0x845   :  { %v1719_v39 = vadd.f32 %v1639_v26, %v1569_v34 }
 0x846   :  { %v1908_v37 = vmul.f32 -1.442695, %v1712_v21 }
 0x847   :  { %v1909_v40 = vmul.f32 -1.442695, %v1719_v39 }
 0x848   :  { %2930 = vpow2.f32 %v1908_v37 }
 0x849   :  { %2932 = vpow2.f32 %v1909_v40 }
 0x852   :  { %v2931_v11 = vpop.eup %2930 }
 0x853   :  { %v1716_v46 = vadd.f32 1.0, %v2931_v11  ;;  %v2933_v33 = vpop.eup %2932 }
 0x854   :  { %v1723_v48 = vadd.f32 1.0, %v2933_v33 }
 0x855   :  { %2934 = vrcp.f32 %v1716_v46 }
 0x856   :  { %2936 = vrcp.f32 %v1723_v48 }
 0x85f   :  { %v2935_v50 = vpop.eup %2934 }
 0x860   :  { %v1727_v59 = vmul.f32 %v2935_v50, %v1726_v42  ;;  %v2937_v60 = vpop.eup %2936 }
 0x861   :  { %v1730_v3 = vsub.f32 1.0, %v2937_v60  ;;  %v1732_v16 = vmul.f32 %v2937_v60, %v3551_v31 }
 0x862   :  { %v1728_v44 = vadd.f32 %v1727_v59, %v1570_v57 }
 0x864   :  { %2938 = vtanh.f32 %v1728_v44 }
 0x86e   :  { %v2939_v5 = vpop.eup %2938 }
 0x86f   :  { %v1731_v6 = vmul.f32 %v2939_v5, %v1730_v3 }
 0x871   :  { %v1733_v17 = vadd.f32 %v1732_v16, %v1731_v6 }
 0x873   :  { %2377 = vmatmul.mubr.f32.vlgmr.msra.gmra.mrb[16].mxu0 %v1733_v17 }
 0x946   :  { %v1827_v0 = vpop.f32.mrb[16].mxu0 }
 0x947   :  { %v1828_v2 = vadd.f32 %v1910_v22, %v1827_v0  ;;  %v2378_v25 = vpop.f32.mrb[17].mxu0 }
 0x949   :  { %1831 = vst [vmem:[#allocation9] sm:$0xff] %v1828_v2 }
 0x94a   :  { %2995 = shalt.err (!%p2992_p6)
}
 0x94b   :  { %s2996_s3 = scalar_lea.hbm %s3591_s7, 128 }
 0x94c   :  { %p2997_p7 = scmp.ne.s32.totalorder %s3591_s7, %s2996_s3  ;;  %p3000_p8 = scmp.lt.u32.totalorder %s2996_s3, %s3591_s7 }
 0x94e   :  { %p3002_p9 = pnand %p3000_p8, %p2997_p7 }
 0x950   :  { %3005 = shalt.err (!%p3002_p9)
}
 0x951   :  { %1841 = dma.vmem_to_hbm [thread:$0]  %s1839_s2, 128, %s3591_s7, [#allocation10]  }
 0x952   :  { %3018 = dma.done.wait [#allocation10], 128  }
 0x953   :  { %3019 = vsyncadd [#allocation10], 4294967168 }
 0x954   :  { %1845 = vsyncpa [#allocation10], 1 }

</bundles_post_ra>
